<compile_context>
chip_gen: v7x
topology: tpu7x:2x2x1
jax: 0.10.0
libtpu: 0.0.40
codegen_flags: <defaults>
</compile_context>

<pallas_src>
import numpy as np
import jax
import jax.numpy as jnp
from jax import lax
from jax.experimental import pallas as pl
from jax.experimental.pallas import tpu as pltpu  # noqa: F401  (not needed at this size)

# ----------------------------- configuration --------------------------------
N_LAYER  = 2
N_HEAD   = 4
D_MODEL  = 32
D_INNER  = 64
DROPOUT  = 0.1          # identity at inference
N_TOKENS = 8
BATCH    = 2
D_HEAD   = D_MODEL // N_HEAD
LN_EPS   = 1e-6

PARAM_ORDER = ("w_qkv", "wo",
               "ln1_g", "ln1_b",
               "w1", "b1", "w2", "b2",
               "ln2_g", "ln2_b")


# --------------------------- positional encoding ----------------------------
def sinusoid_table(n_pos: int, d_hid: int) -> jnp.ndarray:
    pos = np.arange(n_pos, dtype=np.float64)[:, None]
    hid = np.arange(d_hid, dtype=np.float64)[None, :]
    angle = pos / np.power(10000.0, 2.0 * np.floor(hid / 2.0) / d_hid)
    table = np.empty((n_pos, d_hid), dtype=np.float64)
    table[:, 0::2] = np.sin(angle[:, 0::2])
    table[:, 1::2] = np.cos(angle[:, 1::2])
    return jnp.asarray(table, dtype=jnp.float32)          # (n_pos, d_hid)


# ------------------------------ Pallas kernel --------------------------------
def _layer_norm(x, gamma, beta):
    mean = jnp.mean(x, axis=-1, keepdims=True)
    var = jnp.mean((x - mean) ** 2, axis=-1, keepdims=True)
    return (x - mean) * lax.rsqrt(var + LN_EPS) * gamma + beta


def _fused_encoder_kernel(x_ref, pos_ref,
                          w_qkv_ref, wo_ref,
                          ln1_g_ref, ln1_b_ref,
                          w1_ref, b1_ref, w2_ref, b2_ref,
                          ln2_g_ref, ln2_b_ref,
                          o_ref):
    # x_ref: (B*N, D) flat activations, pos_ref: (N, D)
    bn = x_ref.shape[0]
    n = pos_ref.shape[0]
    b = bn // n
    d = x_ref.shape[1]

    # enc_input = x + pos (broadcast over batch); dropout == identity (inference)
    h = x_ref[...] + jnp.tile(pos_ref[...], (b, 1))          # (BN, D)

    # Unrolled layer loop: all stacked weights stay resident in VMEM for the
    # whole kernel; `w_ref[l]` is a static first-axis slice (no DMA re-fetch).
    for l in range(N_LAYER):
        # ---- multi-head self-attention (no projection bias) ----
        # Fused Q/K/V projection: one (BN, D) @ (D, 3D) MXU op.
        # 1/sqrt(d_head) scale is pre-folded into the Q columns of w_qkv.
        qkv = jnp.dot(h, w_qkv_ref[l], preferred_element_type=jnp.float32)  # (BN, 3D)
        qkv3 = qkv.reshape(b, n, 3 * d)        # leading-dim split only (layout safe)

        ctx_heads = []
        for hh in range(N_HEAD):
            c0 = hh * D_HEAD
            qh = qkv3[:, :, c0:c0 + D_HEAD]                    # (B, N, dh)
            kh = qkv3[:, :, d + c0:d + c0 + D_HEAD]
            vh = qkv3[:, :, 2 * d + c0:2 * d + c0 + D_HEAD]
            # batched over B: one dot_general per head instead of one per (b, head)
            s = jnp.einsum('bqd,bkd->bqk', qh, kh,
                           preferred_element_type=jnp.float32)  # (B, N, N)
            s = s - jnp.max(s, axis=-1, keepdims=True)
            p = jnp.exp(s)
            p = p / jnp.sum(p, axis=-1, keepdims=True)          # exact softmax
            ctx_heads.append(jnp.einsum('bqk,bkd->bqd', p, vh,
                                        preferred_element_type=jnp.float32))
        ctx = jnp.concatenate(ctx_heads, axis=-1)               # (B, N, D)
        ctx2 = ctx.reshape(bn, d)                               # merge leading dims

        attn_out = jnp.dot(ctx2, wo_ref[l], preferred_element_type=jnp.float32)
        h = _layer_norm(attn_out + h, ln1_g_ref[l], ln1_b_ref[l])

        # ---- position-wise feed-forward (with bias) ----
        ff = jnp.dot(h, w1_ref[l], preferred_element_type=jnp.float32) + b1_ref[l]
        ff = jnp.maximum(ff, 0.0)
        ff = jnp.dot(ff, w2_ref[l], preferred_element_type=jnp.float32) + b2_ref[l]
        h = _layer_norm(ff + h, ln2_g_ref[l], ln2_b_ref[l])

    o_ref[...] = h


# ------------------------------ JAX wrapper ----------------------------------
@jax.jit
def transformer_encoder(x, pos_table, params):
    # x: (B, N, D).  Weights are stored as [in_features, out_features] (x @ W),
    # stacked with a leading N_LAYER axis; q/k/v fused into w_qkv (L, D, 3D).
    B, N, D = x.shape
    x2 = x.reshape(B * N, D)
    out2 = pl.pallas_call(
        _fused_encoder_kernel,
        out_shape=jax.ShapeDtypeStruct((B * N, D), jnp.float32),
    )(x2, pos_table[:N], *[params[k] for k in PARAM_ORDER])
    return out2.reshape(B, N, D)


def init_params(key):
    ks = jax.random.split(key, 6)
    scale = 0.02
    L = N_LAYER
    wq = scale * jax.random.normal(ks[0], (L, D_MODEL, D_MODEL), jnp.float32)
    wk = scale * jax.random.normal(ks[1], (L, D_MODEL, D_MODEL), jnp.float32)
    wv = scale * jax.random.normal(ks[2], (L, D_MODEL, D_MODEL), jnp.float32)
    # Fold the 1/sqrt(d_head) attention scale into the Q projection (one-time,
    # mathematically identical) and fuse q/k/v into a single (L, D, 3D) weight.
    att_scale = jnp.float32(1.0 / np.sqrt(D_HEAD))
    w_qkv = jnp.concatenate([wq * att_scale, wk, wv], axis=-1)   # (L, D, 3D)
    return {
        "w_qkv": w_qkv,
        "wo": scale * jax.random.normal(ks[3], (L, D_MODEL, D_MODEL), jnp.float32),
        "ln1_g": jnp.ones((L, 1, D_MODEL), jnp.float32),
        "ln1_b": jnp.zeros((L, 1, D_MODEL), jnp.float32),
        "w1": scale * jax.random.normal(ks[4], (L, D_MODEL, D_INNER), jnp.float32),
        "b1": jnp.zeros((L, 1, D_INNER), jnp.float32),
        "w2": scale * jax.random.normal(ks[5], (L, D_INNER, D_MODEL), jnp.float32),
        "b2": jnp.zeros((L, 1, D_MODEL), jnp.float32),
        "ln2_g": jnp.ones((L, 1, D_MODEL), jnp.float32),
        "ln2_b": jnp.zeros((L, 1, D_MODEL), jnp.float32),
    }


# ---------------------------------- main -------------------------------------
if __name__ == "__main__":
    key = jax.random.PRNGKey(0)
    kx, kp = jax.random.split(key)
    x = jax.random.normal(kx, (BATCH, N_TOKENS, D_MODEL), dtype=jnp.float32)
    pos = sinusoid_table(N_TOKENS, D_MODEL)
    params = init_params(kp)

    out = transformer_encoder(x, pos, params)
    jax.block_until_ready(out)
    assert out.shape == (BATCH, N_TOKENS, D_MODEL) and out.dtype == jnp.float32
    print("KERNEL_OK")
</pallas_src>

<mosaic_0001>
module attributes {stable_mosaic.version = 11 : i64} {
  func.func @_fused_encoder_kernel(%arg0: memref<16x32xf32, #tpu.memory_space<vmem>>, %arg1: memref<8x32xf32, #tpu.memory_space<vmem>>, %arg2: memref<2x32x96xf32, #tpu.memory_space<vmem>>, %arg3: memref<2x32x32xf32, #tpu.memory_space<vmem>>, %arg4: memref<2x1x32xf32, #tpu.memory_space<vmem>>, %arg5: memref<2x1x32xf32, #tpu.memory_space<vmem>>, %arg6: memref<2x32x64xf32, #tpu.memory_space<vmem>>, %arg7: memref<2x1x64xf32, #tpu.memory_space<vmem>>, %arg8: memref<2x64x32xf32, #tpu.memory_space<vmem>>, %arg9: memref<2x1x32xf32, #tpu.memory_space<vmem>>, %arg10: memref<2x1x32xf32, #tpu.memory_space<vmem>>, %arg11: memref<2x1x32xf32, #tpu.memory_space<vmem>>, %arg12: memref<16x32xf32, #tpu.memory_space<vmem>>) attributes {dimension_semantics = [], scalar_prefetch = 0 : i64, scratch_operands = 0 : i64, tpu.core_type = #tpu.core_type<tc>} {
    %c0 = arith.constant 0 : index
    %c0_0 = arith.constant 0 : index
    %0 = vector.load %arg0[%c0, %c0_0] : memref<16x32xf32, #tpu.memory_space<vmem>>, vector<16x32xf32>
    %c0_1 = arith.constant 0 : index
    %c0_2 = arith.constant 0 : index
    %1 = vector.load %arg1[%c0_1, %c0_2] : memref<8x32xf32, #tpu.memory_space<vmem>>, vector<8x32xf32>
    %2 = tpu.concatenate %1, %1 in 0 : vector<8x32xf32>, vector<8x32xf32> -> vector<16x32xf32>
    %3 = arith.addf %0, %2 : vector<16x32xf32>
    %c0_3 = arith.constant 0 : index
    %c0_4 = arith.constant 0 : index
    %c0_5 = arith.constant 0 : index
    %4 = vector.load %arg2[%c0_3, %c0_4, %c0_5] : memref<2x32x96xf32, #tpu.memory_space<vmem>>, vector<1x32x96xf32>
    %5 = vector.shape_cast %4 : vector<1x32x96xf32> to vector<32x96xf32>
    %cst = arith.constant dense<0.000000e+00> : vector<16x96xf32>
    %6 = tpu.matmul %3, %5, %cst {dimension_numbers = #tpu.dot_dimension_numbers<[1], [0], [0], [1], [0, 0, 1, 1], [], []>} : vector<16x32xf32>, vector<32x96xf32>, vector<16x96xf32> -> vector<16x96xf32>
    %7 = vector.shape_cast %6 : vector<16x96xf32> to vector<2x8x96xf32>
    %8 = vector.extract_strided_slice %7 {offsets = [0, 0, 0], sizes = [2, 8, 8], strides = [1, 1, 1]} : vector<2x8x96xf32> to vector<2x8x8xf32>
    %9 = vector.extract_strided_slice %7 {offsets = [0, 0, 32], sizes = [2, 8, 8], strides = [1, 1, 1]} : vector<2x8x96xf32> to vector<2x8x8xf32>
    %10 = vector.extract_strided_slice %7 {offsets = [0, 0, 64], sizes = [2, 8, 8], strides = [1, 1, 1]} : vector<2x8x96xf32> to vector<2x8x8xf32>
    "tpu.trace_start"() <{level = 10 : i32, message = "bqd,bkd->bqk"}> : () -> ()
    %cst_6 = arith.constant dense<0.000000e+00> : vector<2x8x8xf32>
    %11 = tpu.matmul %8, %9, %cst_6 {dimension_numbers = #tpu.dot_dimension_numbers<[2], [2], [1], [1], [0, 0, 0, 1, 1, 1], [0], [0]>} : vector<2x8x8xf32>, vector<2x8x8xf32>, vector<2x8x8xf32> -> vector<2x8x8xf32>
    "tpu.trace_stop"() : () -> ()
    %cst_7 = arith.constant dense<0xFF800000> : vector<2x8xf32>
    %12 = vector.multi_reduction <maximumf>, %11, %cst_7 [2] : vector<2x8x8xf32> to vector<2x8xf32>
    %13 = vector.shape_cast %12 : vector<2x8xf32> to vector<2x8x1xf32>
    %14 = vector.broadcast %13 : vector<2x8x1xf32> to vector<2x8x8xf32>
    %15 = arith.subf %11, %14 : vector<2x8x8xf32>
    %16 = math.exp %15 : vector<2x8x8xf32>
    %cst_8 = arith.constant dense<0.000000e+00> : vector<2x8xf32>
    %17 = vector.multi_reduction <add>, %16, %cst_8 [2] : vector<2x8x8xf32> to vector<2x8xf32>
    %18 = vector.shape_cast %17 : vector<2x8xf32> to vector<2x8x1xf32>
    %19 = vector.broadcast %18 : vector<2x8x1xf32> to vector<2x8x8xf32>
    %20 = arith.divf %16, %19 : vector<2x8x8xf32>
    "tpu.trace_start"() <{level = 10 : i32, message = "bqk,bkd->bqd"}> : () -> ()
    %cst_9 = arith.constant dense<0.000000e+00> : vector<2x8x8xf32>
    %21 = tpu.matmul %20, %10, %cst_9 {dimension_numbers = #tpu.dot_dimension_numbers<[2], [1], [1], [2], [0, 0, 0, 1, 1, 2], [0], [0]>} : vector<2x8x8xf32>, vector<2x8x8xf32>, vector<2x8x8xf32> -> vector<2x8x8xf32>
    "tpu.trace_stop"() : () -> ()
    %22 = vector.extract_strided_slice %7 {offsets = [0, 0, 8], sizes = [2, 8, 8], strides = [1, 1, 1]} : vector<2x8x96xf32> to vector<2x8x8xf32>
    %23 = vector.extract_strided_slice %7 {offsets = [0, 0, 40], sizes = [2, 8, 8], strides = [1, 1, 1]} : vector<2x8x96xf32> to vector<2x8x8xf32>
    %24 = vector.extract_strided_slice %7 {offsets = [0, 0, 72], sizes = [2, 8, 8], strides = [1, 1, 1]} : vector<2x8x96xf32> to vector<2x8x8xf32>
    "tpu.trace_start"() <{level = 10 : i32, message = "bqd,bkd->bqk"}> : () -> ()
    %cst_10 = arith.constant dense<0.000000e+00> : vector<2x8x8xf32>
    %25 = tpu.matmul %22, %23, %cst_10 {dimension_numbers = #tpu.dot_dimension_numbers<[2], [2], [1], [1], [0, 0, 0, 1, 1, 1], [0], [0]>} : vector<2x8x8xf32>, vector<2x8x8xf32>, vector<2x8x8xf32> -> vector<2x8x8xf32>
    "tpu.trace_stop"() : () -> ()
    %cst_11 = arith.constant dense<0xFF800000> : vector<2x8xf32>
    %26 = vector.multi_reduction <maximumf>, %25, %cst_11 [2] : vector<2x8x8xf32> to vector<2x8xf32>
    %27 = vector.shape_cast %26 : vector<2x8xf32> to vector<2x8x1xf32>
    %28 = vector.broadcast %27 : vector<2x8x1xf32> to vector<2x8x8xf32>
    %29 = arith.subf %25, %28 : vector<2x8x8xf32>
    %30 = math.exp %29 : vector<2x8x8xf32>
    %cst_12 = arith.constant dense<0.000000e+00> : vector<2x8xf32>
    %31 = vector.multi_reduction <add>, %30, %cst_12 [2] : vector<2x8x8xf32> to vector<2x8xf32>
    %32 = vector.shape_cast %31 : vector<2x8xf32> to vector<2x8x1xf32>
    %33 = vector.broadcast %32 : vector<2x8x1xf32> to vector<2x8x8xf32>
    %34 = arith.divf %30, %33 : vector<2x8x8xf32>
    "tpu.trace_start"() <{level = 10 : i32, message = "bqk,bkd->bqd"}> : () -> ()
    %cst_13 = arith.constant dense<0.000000e+00> : vector<2x8x8xf32>
    %35 = tpu.matmul %34, %24, %cst_13 {dimension_numbers = #tpu.dot_dimension_numbers<[2], [1], [1], [2], [0, 0, 0, 1, 1, 2], [0], [0]>} : vector<2x8x8xf32>, vector<2x8x8xf32>, vector<2x8x8xf32> -> vector<2x8x8xf32>
    "tpu.trace_stop"() : () -> ()
    %36 = vector.extract_strided_slice %7 {offsets = [0, 0, 16], sizes = [2, 8, 8], strides = [1, 1, 1]} : vector<2x8x96xf32> to vector<2x8x8xf32>
    %37 = vector.extract_strided_slice %7 {offsets = [0, 0, 48], sizes = [2, 8, 8], strides = [1, 1, 1]} : vector<2x8x96xf32> to vector<2x8x8xf32>
    %38 = vector.extract_strided_slice %7 {offsets = [0, 0, 80], sizes = [2, 8, 8], strides = [1, 1, 1]} : vector<2x8x96xf32> to vector<2x8x8xf32>
    "tpu.trace_start"() <{level = 10 : i32, message = "bqd,bkd->bqk"}> : () -> ()
    %cst_14 = arith.constant dense<0.000000e+00> : vector<2x8x8xf32>
    %39 = tpu.matmul %36, %37, %cst_14 {dimension_numbers = #tpu.dot_dimension_numbers<[2], [2], [1], [1], [0, 0, 0, 1, 1, 1], [0], [0]>} : vector<2x8x8xf32>, vector<2x8x8xf32>, vector<2x8x8xf32> -> vector<2x8x8xf32>
    "tpu.trace_stop"() : () -> ()
    %cst_15 = arith.constant dense<0xFF800000> : vector<2x8xf32>
    %40 = vector.multi_reduction <maximumf>, %39, %cst_15 [2] : vector<2x8x8xf32> to vector<2x8xf32>
    %41 = vector.shape_cast %40 : vector<2x8xf32> to vector<2x8x1xf32>
    %42 = vector.broadcast %41 : vector<2x8x1xf32> to vector<2x8x8xf32>
    %43 = arith.subf %39, %42 : vector<2x8x8xf32>
    %44 = math.exp %43 : vector<2x8x8xf32>
    %cst_16 = arith.constant dense<0.000000e+00> : vector<2x8xf32>
    %45 = vector.multi_reduction <add>, %44, %cst_16 [2] : vector<2x8x8xf32> to vector<2x8xf32>
    %46 = vector.shape_cast %45 : vector<2x8xf32> to vector<2x8x1xf32>
    %47 = vector.broadcast %46 : vector<2x8x1xf32> to vector<2x8x8xf32>
    %48 = arith.divf %44, %47 : vector<2x8x8xf32>
    "tpu.trace_start"() <{level = 10 : i32, message = "bqk,bkd->bqd"}> : () -> ()
    %cst_17 = arith.constant dense<0.000000e+00> : vector<2x8x8xf32>
    %49 = tpu.matmul %48, %38, %cst_17 {dimension_numbers = #tpu.dot_dimension_numbers<[2], [1], [1], [2], [0, 0, 0, 1, 1, 2], [0], [0]>} : vector<2x8x8xf32>, vector<2x8x8xf32>, vector<2x8x8xf32> -> vector<2x8x8xf32>
    "tpu.trace_stop"() : () -> ()
    %50 = vector.extract_strided_slice %7 {offsets = [0, 0, 24], sizes = [2, 8, 8], strides = [1, 1, 1]} : vector<2x8x96xf32> to vector<2x8x8xf32>
    %51 = vector.extract_strided_slice %7 {offsets = [0, 0, 56], sizes = [2, 8, 8], strides = [1, 1, 1]} : vector<2x8x96xf32> to vector<2x8x8xf32>
    %52 = vector.extract_strided_slice %7 {offsets = [0, 0, 88], sizes = [2, 8, 8], strides = [1, 1, 1]} : vector<2x8x96xf32> to vector<2x8x8xf32>
    "tpu.trace_start"() <{level = 10 : i32, message = "bqd,bkd->bqk"}> : () -> ()
    %cst_18 = arith.constant dense<0.000000e+00> : vector<2x8x8xf32>
    %53 = tpu.matmul %50, %51, %cst_18 {dimension_numbers = #tpu.dot_dimension_numbers<[2], [2], [1], [1], [0, 0, 0, 1, 1, 1], [0], [0]>} : vector<2x8x8xf32>, vector<2x8x8xf32>, vector<2x8x8xf32> -> vector<2x8x8xf32>
    "tpu.trace_stop"() : () -> ()
    %cst_19 = arith.constant dense<0xFF800000> : vector<2x8xf32>
    %54 = vector.multi_reduction <maximumf>, %53, %cst_19 [2] : vector<2x8x8xf32> to vector<2x8xf32>
    %55 = vector.shape_cast %54 : vector<2x8xf32> to vector<2x8x1xf32>
    %56 = vector.broadcast %55 : vector<2x8x1xf32> to vector<2x8x8xf32>
    %57 = arith.subf %53, %56 : vector<2x8x8xf32>
    %58 = math.exp %57 : vector<2x8x8xf32>
    %cst_20 = arith.constant dense<0.000000e+00> : vector<2x8xf32>
    %59 = vector.multi_reduction <add>, %58, %cst_20 [2] : vector<2x8x8xf32> to vector<2x8xf32>
    %60 = vector.shape_cast %59 : vector<2x8xf32> to vector<2x8x1xf32>
    %61 = vector.broadcast %60 : vector<2x8x1xf32> to vector<2x8x8xf32>
    %62 = arith.divf %58, %61 : vector<2x8x8xf32>
    "tpu.trace_start"() <{level = 10 : i32, message = "bqk,bkd->bqd"}> : () -> ()
    %cst_21 = arith.constant dense<0.000000e+00> : vector<2x8x8xf32>
    %63 = tpu.matmul %62, %52, %cst_21 {dimension_numbers = #tpu.dot_dimension_numbers<[2], [1], [1], [2], [0, 0, 0, 1, 1, 2], [0], [0]>} : vector<2x8x8xf32>, vector<2x8x8xf32>, vector<2x8x8xf32> -> vector<2x8x8xf32>
    "tpu.trace_stop"() : () -> ()
    %64 = tpu.concatenate %21, %35, %49, %63 in 2 : vector<2x8x8xf32>, vector<2x8x8xf32>, vector<2x8x8xf32>, vector<2x8x8xf32> -> vector<2x8x32xf32>
    %65 = vector.shape_cast %64 : vector<2x8x32xf32> to vector<16x32xf32>
    %c0_22 = arith.constant 0 : index
    %c0_23 = arith.constant 0 : index
    %c0_24 = arith.constant 0 : index
    %66 = vector.load %arg3[%c0_22, %c0_23, %c0_24] : memref<2x32x32xf32, #tpu.memory_space<vmem>>, vector<1x32x32xf32>
    %67 = vector.shape_cast %66 : vector<1x32x32xf32> to vector<32x32xf32>
    %cst_25 = arith.constant dense<0.000000e+00> : vector<16x32xf32>
    %68 = tpu.matmul %65, %67, %cst_25 {dimension_numbers = #tpu.dot_dimension_numbers<[1], [0], [0], [1], [0, 0, 1, 1], [], []>} : vector<16x32xf32>, vector<32x32xf32>, vector<16x32xf32> -> vector<16x32xf32>
    %69 = arith.addf %68, %3 : vector<16x32xf32>
    %c0_26 = arith.constant 0 : index
    %c0_27 = arith.constant 0 : index
    %c0_28 = arith.constant 0 : index
    %70 = vector.load %arg4[%c0_26, %c0_27, %c0_28] : memref<2x1x32xf32, #tpu.memory_space<vmem>>, vector<1x1x32xf32>
    %71 = vector.shape_cast %70 : vector<1x1x32xf32> to vector<1x32xf32>
    %c0_29 = arith.constant 0 : index
    %c0_30 = arith.constant 0 : index
    %c0_31 = arith.constant 0 : index
    %72 = vector.load %arg5[%c0_29, %c0_30, %c0_31] : memref<2x1x32xf32, #tpu.memory_space<vmem>>, vector<1x1x32xf32>
    %73 = vector.shape_cast %72 : vector<1x1x32xf32> to vector<1x32xf32>
    %cst_32 = arith.constant dense<0.000000e+00> : vector<16xf32>
    %74 = vector.multi_reduction <add>, %69, %cst_32 [1] : vector<16x32xf32> to vector<16xf32>
    %75 = vector.shape_cast %74 : vector<16xf32> to vector<16x1xf32>
    %cst_33 = arith.constant 3.200000e+01 : f32
    %76 = vector.broadcast %cst_33 : f32 to vector<16x1xf32>
    %77 = arith.divf %75, %76 : vector<16x1xf32>
    %78 = vector.broadcast %77 : vector<16x1xf32> to vector<16x32xf32>
    %79 = arith.subf %69, %78 : vector<16x32xf32>
    %80 = arith.mulf %79, %79 : vector<16x32xf32>
    %cst_34 = arith.constant dense<0.000000e+00> : vector<16xf32>
    %81 = vector.multi_reduction <add>, %80, %cst_34 [1] : vector<16x32xf32> to vector<16xf32>
    %82 = vector.shape_cast %81 : vector<16xf32> to vector<16x1xf32>
    %cst_35 = arith.constant 3.200000e+01 : f32
    %83 = vector.broadcast %cst_35 : f32 to vector<16x1xf32>
    %84 = arith.divf %82, %83 : vector<16x1xf32>
    %85 = vector.broadcast %77 : vector<16x1xf32> to vector<16x32xf32>
    %86 = arith.subf %69, %85 : vector<16x32xf32>
    %cst_36 = arith.constant 9.99999997E-7 : f32
    %87 = vector.broadcast %cst_36 : f32 to vector<16x1xf32>
    %88 = arith.addf %84, %87 : vector<16x1xf32>
    %89 = math.rsqrt %88 : vector<16x1xf32>
    %90 = vector.broadcast %89 : vector<16x1xf32> to vector<16x32xf32>
    %91 = arith.mulf %86, %90 : vector<16x32xf32>
    %92 = vector.broadcast %71 : vector<1x32xf32> to vector<16x32xf32>
    %93 = arith.mulf %91, %92 : vector<16x32xf32>
    %94 = vector.broadcast %73 : vector<1x32xf32> to vector<16x32xf32>
    %95 = arith.addf %93, %94 : vector<16x32xf32>
    %c0_37 = arith.constant 0 : index
    %c0_38 = arith.constant 0 : index
    %c0_39 = arith.constant 0 : index
    %96 = vector.load %arg6[%c0_37, %c0_38, %c0_39] : memref<2x32x64xf32, #tpu.memory_space<vmem>>, vector<1x32x64xf32>
    %97 = vector.shape_cast %96 : vector<1x32x64xf32> to vector<32x64xf32>
    %cst_40 = arith.constant dense<0.000000e+00> : vector<16x64xf32>
    %98 = tpu.matmul %95, %97, %cst_40 {dimension_numbers = #tpu.dot_dimension_numbers<[1], [0], [0], [1], [0, 0, 1, 1], [], []>} : vector<16x32xf32>, vector<32x64xf32>, vector<16x64xf32> -> vector<16x64xf32>
    %c0_41 = arith.constant 0 : index
    %c0_42 = arith.constant 0 : index
    %c0_43 = arith.constant 0 : index
    %99 = vector.load %arg7[%c0_41, %c0_42, %c0_43] : memref<2x1x64xf32, #tpu.memory_space<vmem>>, vector<1x1x64xf32>
    %100 = vector.shape_cast %99 : vector<1x1x64xf32> to vector<1x64xf32>
    %101 = vector.broadcast %100 : vector<1x64xf32> to vector<16x64xf32>
    %102 = arith.addf %98, %101 : vector<16x64xf32>
    %cst_44 = arith.constant 0.000000e+00 : f32
    %103 = vector.broadcast %cst_44 : f32 to vector<16x64xf32>
    %104 = arith.maximumf %102, %103 : vector<16x64xf32>
    %c0_45 = arith.constant 0 : index
    %c0_46 = arith.constant 0 : index
    %c0_47 = arith.constant 0 : index
    %105 = vector.load %arg8[%c0_45, %c0_46, %c0_47] : memref<2x64x32xf32, #tpu.memory_space<vmem>>, vector<1x64x32xf32>
    %106 = vector.shape_cast %105 : vector<1x64x32xf32> to vector<64x32xf32>
    %cst_48 = arith.constant dense<0.000000e+00> : vector<16x32xf32>
    %107 = tpu.matmul %104, %106, %cst_48 {dimension_numbers = #tpu.dot_dimension_numbers<[1], [0], [0], [1], [0, 0, 1, 1], [], []>} : vector<16x64xf32>, vector<64x32xf32>, vector<16x32xf32> -> vector<16x32xf32>
    %c0_49 = arith.constant 0 : index
    %c0_50 = arith.constant 0 : index
    %c0_51 = arith.constant 0 : index
    %108 = vector.load %arg9[%c0_49, %c0_50, %c0_51] : memref<2x1x32xf32, #tpu.memory_space<vmem>>, vector<1x1x32xf32>
    %109 = vector.shape_cast %108 : vector<1x1x32xf32> to vector<1x32xf32>
    %110 = vector.broadcast %109 : vector<1x32xf32> to vector<16x32xf32>
    %111 = arith.addf %107, %110 : vector<16x32xf32>
    %112 = arith.addf %111, %95 : vector<16x32xf32>
    %c0_52 = arith.constant 0 : index
    %c0_53 = arith.constant 0 : index
    %c0_54 = arith.constant 0 : index
    %113 = vector.load %arg10[%c0_52, %c0_53, %c0_54] : memref<2x1x32xf32, #tpu.memory_space<vmem>>, vector<1x1x32xf32>
    %114 = vector.shape_cast %113 : vector<1x1x32xf32> to vector<1x32xf32>
    %c0_55 = arith.constant 0 : index
    %c0_56 = arith.constant 0 : index
    %c0_57 = arith.constant 0 : index
    %115 = vector.load %arg11[%c0_55, %c0_56, %c0_57] : memref<2x1x32xf32, #tpu.memory_space<vmem>>, vector<1x1x32xf32>
    %116 = vector.shape_cast %115 : vector<1x1x32xf32> to vector<1x32xf32>
    %cst_58 = arith.constant dense<0.000000e+00> : vector<16xf32>
    %117 = vector.multi_reduction <add>, %112, %cst_58 [1] : vector<16x32xf32> to vector<16xf32>
    %118 = vector.shape_cast %117 : vector<16xf32> to vector<16x1xf32>
    %cst_59 = arith.constant 3.200000e+01 : f32
    %119 = vector.broadcast %cst_59 : f32 to vector<16x1xf32>
    %120 = arith.divf %118, %119 : vector<16x1xf32>
    %121 = vector.broadcast %120 : vector<16x1xf32> to vector<16x32xf32>
    %122 = arith.subf %112, %121 : vector<16x32xf32>
    %123 = arith.mulf %122, %122 : vector<16x32xf32>
    %cst_60 = arith.constant dense<0.000000e+00> : vector<16xf32>
    %124 = vector.multi_reduction <add>, %123, %cst_60 [1] : vector<16x32xf32> to vector<16xf32>
    %125 = vector.shape_cast %124 : vector<16xf32> to vector<16x1xf32>
    %cst_61 = arith.constant 3.200000e+01 : f32
    %126 = vector.broadcast %cst_61 : f32 to vector<16x1xf32>
    %127 = arith.divf %125, %126 : vector<16x1xf32>
    %128 = vector.broadcast %120 : vector<16x1xf32> to vector<16x32xf32>
    %129 = arith.subf %112, %128 : vector<16x32xf32>
    %cst_62 = arith.constant 9.99999997E-7 : f32
    %130 = vector.broadcast %cst_62 : f32 to vector<16x1xf32>
    %131 = arith.addf %127, %130 : vector<16x1xf32>
    %132 = math.rsqrt %131 : vector<16x1xf32>
    %133 = vector.broadcast %132 : vector<16x1xf32> to vector<16x32xf32>
    %134 = arith.mulf %129, %133 : vector<16x32xf32>
    %135 = vector.broadcast %114 : vector<1x32xf32> to vector<16x32xf32>
    %136 = arith.mulf %134, %135 : vector<16x32xf32>
    %137 = vector.broadcast %116 : vector<1x32xf32> to vector<16x32xf32>
    %138 = arith.addf %136, %137 : vector<16x32xf32>
    %c1 = arith.constant 1 : index
    %c0_63 = arith.constant 0 : index
    %c0_64 = arith.constant 0 : index
    %139 = vector.load %arg2[%c1, %c0_63, %c0_64] : memref<2x32x96xf32, #tpu.memory_space<vmem>>, vector<1x32x96xf32>
    %140 = vector.shape_cast %139 : vector<1x32x96xf32> to vector<32x96xf32>
    %cst_65 = arith.constant dense<0.000000e+00> : vector<16x96xf32>
    %141 = tpu.matmul %138, %140, %cst_65 {dimension_numbers = #tpu.dot_dimension_numbers<[1], [0], [0], [1], [0, 0, 1, 1], [], []>} : vector<16x32xf32>, vector<32x96xf32>, vector<16x96xf32> -> vector<16x96xf32>
    %142 = vector.shape_cast %141 : vector<16x96xf32> to vector<2x8x96xf32>
    %143 = vector.extract_strided_slice %142 {offsets = [0, 0, 0], sizes = [2, 8, 8], strides = [1, 1, 1]} : vector<2x8x96xf32> to vector<2x8x8xf32>
    %144 = vector.extract_strided_slice %142 {offsets = [0, 0, 32], sizes = [2, 8, 8], strides = [1, 1, 1]} : vector<2x8x96xf32> to vector<2x8x8xf32>
    %145 = vector.extract_strided_slice %142 {offsets = [0, 0, 64], sizes = [2, 8, 8], strides = [1, 1, 1]} : vector<2x8x96xf32> to vector<2x8x8xf32>
    "tpu.trace_start"() <{level = 10 : i32, message = "bqd,bkd->bqk"}> : () -> ()
    %cst_66 = arith.constant dense<0.000000e+00> : vector<2x8x8xf32>
    %146 = tpu.matmul %143, %144, %cst_66 {dimension_numbers = #tpu.dot_dimension_numbers<[2], [2], [1], [1], [0, 0, 0, 1, 1, 1], [0], [0]>} : vector<2x8x8xf32>, vector<2x8x8xf32>, vector<2x8x8xf32> -> vector<2x8x8xf32>
    "tpu.trace_stop"() : () -> ()
    %cst_67 = arith.constant dense<0xFF800000> : vector<2x8xf32>
    %147 = vector.multi_reduction <maximumf>, %146, %cst_67 [2] : vector<2x8x8xf32> to vector<2x8xf32>
    %148 = vector.shape_cast %147 : vector<2x8xf32> to vector<2x8x1xf32>
    %149 = vector.broadcast %148 : vector<2x8x1xf32> to vector<2x8x8xf32>
    %150 = arith.subf %146, %149 : vector<2x8x8xf32>
    %151 = math.exp %150 : vector<2x8x8xf32>
    %cst_68 = arith.constant dense<0.000000e+00> : vector<2x8xf32>
    %152 = vector.multi_reduction <add>, %151, %cst_68 [2] : vector<2x8x8xf32> to vector<2x8xf32>
    %153 = vector.shape_cast %152 : vector<2x8xf32> to vector<2x8x1xf32>
    %154 = vector.broadcast %153 : vector<2x8x1xf32> to vector<2x8x8xf32>
    %155 = arith.divf %151, %154 : vector<2x8x8xf32>
    "tpu.trace_start"() <{level = 10 : i32, message = "bqk,bkd->bqd"}> : () -> ()
    %cst_69 = arith.constant dense<0.000000e+00> : vector<2x8x8xf32>
    %156 = tpu.matmul %155, %145, %cst_69 {dimension_numbers = #tpu.dot_dimension_numbers<[2], [1], [1], [2], [0, 0, 0, 1, 1, 2], [0], [0]>} : vector<2x8x8xf32>, vector<2x8x8xf32>, vector<2x8x8xf32> -> vector<2x8x8xf32>
    "tpu.trace_stop"() : () -> ()
    %157 = vector.extract_strided_slice %142 {offsets = [0, 0, 8], sizes = [2, 8, 8], strides = [1, 1, 1]} : vector<2x8x96xf32> to vector<2x8x8xf32>
    %158 = vector.extract_strided_slice %142 {offsets = [0, 0, 40], sizes = [2, 8, 8], strides = [1, 1, 1]} : vector<2x8x96xf32> to vector<2x8x8xf32>
    %159 = vector.extract_strided_slice %142 {offsets = [0, 0, 72], sizes = [2, 8, 8], strides = [1, 1, 1]} : vector<2x8x96xf32> to vector<2x8x8xf32>
    "tpu.trace_start"() <{level = 10 : i32, message = "bqd,bkd->bqk"}> : () -> ()
    %cst_70 = arith.constant dense<0.000000e+00> : vector<2x8x8xf32>
    %160 = tpu.matmul %157, %158, %cst_70 {dimension_numbers = #tpu.dot_dimension_numbers<[2], [2], [1], [1], [0, 0, 0, 1, 1, 1], [0], [0]>} : vector<2x8x8xf32>, vector<2x8x8xf32>, vector<2x8x8xf32> -> vector<2x8x8xf32>
    "tpu.trace_stop"() : () -> ()
    %cst_71 = arith.constant dense<0xFF800000> : vector<2x8xf32>
    %161 = vector.multi_reduction <maximumf>, %160, %cst_71 [2] : vector<2x8x8xf32> to vector<2x8xf32>
    %162 = vector.shape_cast %161 : vector<2x8xf32> to vector<2x8x1xf32>
    %163 = vector.broadcast %162 : vector<2x8x1xf32> to vector<2x8x8xf32>
    %164 = arith.subf %160, %163 : vector<2x8x8xf32>
    %165 = math.exp %164 : vector<2x8x8xf32>
    %cst_72 = arith.constant dense<0.000000e+00> : vector<2x8xf32>
    %166 = vector.multi_reduction <add>, %165, %cst_72 [2] : vector<2x8x8xf32> to vector<2x8xf32>
    %167 = vector.shape_cast %166 : vector<2x8xf32> to vector<2x8x1xf32>
    %168 = vector.broadcast %167 : vector<2x8x1xf32> to vector<2x8x8xf32>
    %169 = arith.divf %165, %168 : vector<2x8x8xf32>
    "tpu.trace_start"() <{level = 10 : i32, message = "bqk,bkd->bqd"}> : () -> ()
    %cst_73 = arith.constant dense<0.000000e+00> : vector<2x8x8xf32>
    %170 = tpu.matmul %169, %159, %cst_73 {dimension_numbers = #tpu.dot_dimension_numbers<[2], [1], [1], [2], [0, 0, 0, 1, 1, 2], [0], [0]>} : vector<2x8x8xf32>, vector<2x8x8xf32>, vector<2x8x8xf32> -> vector<2x8x8xf32>
    "tpu.trace_stop"() : () -> ()
    %171 = vector.extract_strided_slice %142 {offsets = [0, 0, 16], sizes = [2, 8, 8], strides = [1, 1, 1]} : vector<2x8x96xf32> to vector<2x8x8xf32>
    %172 = vector.extract_strided_slice %142 {offsets = [0, 0, 48], sizes = [2, 8, 8], strides = [1, 1, 1]} : vector<2x8x96xf32> to vector<2x8x8xf32>
    %173 = vector.extract_strided_slice %142 {offsets = [0, 0, 80], sizes = [2, 8, 8], strides = [1, 1, 1]} : vector<2x8x96xf32> to vector<2x8x8xf32>
    "tpu.trace_start"() <{level = 10 : i32, message = "bqd,bkd->bqk"}> : () -> ()
    %cst_74 = arith.constant dense<0.000000e+00> : vector<2x8x8xf32>
    %174 = tpu.matmul %171, %172, %cst_74 {dimension_numbers = #tpu.dot_dimension_numbers<[2], [2], [1], [1], [0, 0, 0, 1, 1, 1], [0], [0]>} : vector<2x8x8xf32>, vector<2x8x8xf32>, vector<2x8x8xf32> -> vector<2x8x8xf32>
    "tpu.trace_stop"() : () -> ()
    %cst_75 = arith.constant dense<0xFF800000> : vector<2x8xf32>
    %175 = vector.multi_reduction <maximumf>, %174, %cst_75 [2] : vector<2x8x8xf32> to vector<2x8xf32>
    %176 = vector.shape_cast %175 : vector<2x8xf32> to vector<2x8x1xf32>
    %177 = vector.broadcast %176 : vector<2x8x1xf32> to vector<2x8x8xf32>
    %178 = arith.subf %174, %177 : vector<2x8x8xf32>
    %179 = math.exp %178 : vector<2x8x8xf32>
    %cst_76 = arith.constant dense<0.000000e+00> : vector<2x8xf32>
    %180 = vector.multi_reduction <add>, %179, %cst_76 [2] : vector<2x8x8xf32> to vector<2x8xf32>
    %181 = vector.shape_cast %180 : vector<2x8xf32> to vector<2x8x1xf32>
    %182 = vector.broadcast %181 : vector<2x8x1xf32> to vector<2x8x8xf32>
    %183 = arith.divf %179, %182 : vector<2x8x8xf32>
    "tpu.trace_start"() <{level = 10 : i32, message = "bqk,bkd->bqd"}> : () -> ()
    %cst_77 = arith.constant dense<0.000000e+00> : vector<2x8x8xf32>
    %184 = tpu.matmul %183, %173, %cst_77 {dimension_numbers = #tpu.dot_dimension_numbers<[2], [1], [1], [2], [0, 0, 0, 1, 1, 2], [0], [0]>} : vector<2x8x8xf32>, vector<2x8x8xf32>, vector<2x8x8xf32> -> vector<2x8x8xf32>
    "tpu.trace_stop"() : () -> ()
    %185 = vector.extract_strided_slice %142 {offsets = [0, 0, 24], sizes = [2, 8, 8], strides = [1, 1, 1]} : vector<2x8x96xf32> to vector<2x8x8xf32>
    %186 = vector.extract_strided_slice %142 {offsets = [0, 0, 56], sizes = [2, 8, 8], strides = [1, 1, 1]} : vector<2x8x96xf32> to vector<2x8x8xf32>
    %187 = vector.extract_strided_slice %142 {offsets = [0, 0, 88], sizes = [2, 8, 8], strides = [1, 1, 1]} : vector<2x8x96xf32> to vector<2x8x8xf32>
    "tpu.trace_start"() <{level = 10 : i32, message = "bqd,bkd->bqk"}> : () -> ()
    %cst_78 = arith.constant dense<0.000000e+00> : vector<2x8x8xf32>
    %188 = tpu.matmul %185, %186, %cst_78 {dimension_numbers = #tpu.dot_dimension_numbers<[2], [2], [1], [1], [0, 0, 0, 1, 1, 1], [0], [0]>} : vector<2x8x8xf32>, vector<2x8x8xf32>, vector<2x8x8xf32> -> vector<2x8x8xf32>
    "tpu.trace_stop"() : () -> ()
    %cst_79 = arith.constant dense<0xFF800000> : vector<2x8xf32>
    %189 = vector.multi_reduction <maximumf>, %188, %cst_79 [2] : vector<2x8x8xf32> to vector<2x8xf32>
    %190 = vector.shape_cast %189 : vector<2x8xf32> to vector<2x8x1xf32>
    %191 = vector.broadcast %190 : vector<2x8x1xf32> to vector<2x8x8xf32>
    %192 = arith.subf %188, %191 : vector<2x8x8xf32>
    %193 = math.exp %192 : vector<2x8x8xf32>
    %cst_80 = arith.constant dense<0.000000e+00> : vector<2x8xf32>
    %194 = vector.multi_reduction <add>, %193, %cst_80 [2] : vector<2x8x8xf32> to vector<2x8xf32>
    %195 = vector.shape_cast %194 : vector<2x8xf32> to vector<2x8x1xf32>
    %196 = vector.broadcast %195 : vector<2x8x1xf32> to vector<2x8x8xf32>
    %197 = arith.divf %193, %196 : vector<2x8x8xf32>
    "tpu.trace_start"() <{level = 10 : i32, message = "bqk,bkd->bqd"}> : () -> ()
    %cst_81 = arith.constant dense<0.000000e+00> : vector<2x8x8xf32>
    %198 = tpu.matmul %197, %187, %cst_81 {dimension_numbers = #tpu.dot_dimension_numbers<[2], [1], [1], [2], [0, 0, 0, 1, 1, 2], [0], [0]>} : vector<2x8x8xf32>, vector<2x8x8xf32>, vector<2x8x8xf32> -> vector<2x8x8xf32>
    "tpu.trace_stop"() : () -> ()
    %199 = tpu.concatenate %156, %170, %184, %198 in 2 : vector<2x8x8xf32>, vector<2x8x8xf32>, vector<2x8x8xf32>, vector<2x8x8xf32> -> vector<2x8x32xf32>
    %200 = vector.shape_cast %199 : vector<2x8x32xf32> to vector<16x32xf32>
    %c1_82 = arith.constant 1 : index
    %c0_83 = arith.constant 0 : index
    %c0_84 = arith.constant 0 : index
    %201 = vector.load %arg3[%c1_82, %c0_83, %c0_84] : memref<2x32x32xf32, #tpu.memory_space<vmem>>, vector<1x32x32xf32>
    %202 = vector.shape_cast %201 : vector<1x32x32xf32> to vector<32x32xf32>
    %cst_85 = arith.constant dense<0.000000e+00> : vector<16x32xf32>
    %203 = tpu.matmul %200, %202, %cst_85 {dimension_numbers = #tpu.dot_dimension_numbers<[1], [0], [0], [1], [0, 0, 1, 1], [], []>} : vector<16x32xf32>, vector<32x32xf32>, vector<16x32xf32> -> vector<16x32xf32>
    %204 = arith.addf %203, %138 : vector<16x32xf32>
    %c1_86 = arith.constant 1 : index
    %c0_87 = arith.constant 0 : index
    %c0_88 = arith.constant 0 : index
    %205 = vector.load %arg4[%c1_86, %c0_87, %c0_88] : memref<2x1x32xf32, #tpu.memory_space<vmem>>, vector<1x1x32xf32>
    %206 = vector.shape_cast %205 : vector<1x1x32xf32> to vector<1x32xf32>
    %c1_89 = arith.constant 1 : index
    %c0_90 = arith.constant 0 : index
    %c0_91 = arith.constant 0 : index
    %207 = vector.load %arg5[%c1_89, %c0_90, %c0_91] : memref<2x1x32xf32, #tpu.memory_space<vmem>>, vector<1x1x32xf32>
    %208 = vector.shape_cast %207 : vector<1x1x32xf32> to vector<1x32xf32>
    %cst_92 = arith.constant dense<0.000000e+00> : vector<16xf32>
    %209 = vector.multi_reduction <add>, %204, %cst_92 [1] : vector<16x32xf32> to vector<16xf32>
    %210 = vector.shape_cast %209 : vector<16xf32> to vector<16x1xf32>
    %cst_93 = arith.constant 3.200000e+01 : f32
    %211 = vector.broadcast %cst_93 : f32 to vector<16x1xf32>
    %212 = arith.divf %210, %211 : vector<16x1xf32>
    %213 = vector.broadcast %212 : vector<16x1xf32> to vector<16x32xf32>
    %214 = arith.subf %204, %213 : vector<16x32xf32>
    %215 = arith.mulf %214, %214 : vector<16x32xf32>
    %cst_94 = arith.constant dense<0.000000e+00> : vector<16xf32>
    %216 = vector.multi_reduction <add>, %215, %cst_94 [1] : vector<16x32xf32> to vector<16xf32>
    %217 = vector.shape_cast %216 : vector<16xf32> to vector<16x1xf32>
    %cst_95 = arith.constant 3.200000e+01 : f32
    %218 = vector.broadcast %cst_95 : f32 to vector<16x1xf32>
    %219 = arith.divf %217, %218 : vector<16x1xf32>
    %220 = vector.broadcast %212 : vector<16x1xf32> to vector<16x32xf32>
    %221 = arith.subf %204, %220 : vector<16x32xf32>
    %cst_96 = arith.constant 9.99999997E-7 : f32
    %222 = vector.broadcast %cst_96 : f32 to vector<16x1xf32>
    %223 = arith.addf %219, %222 : vector<16x1xf32>
    %224 = math.rsqrt %223 : vector<16x1xf32>
    %225 = vector.broadcast %224 : vector<16x1xf32> to vector<16x32xf32>
    %226 = arith.mulf %221, %225 : vector<16x32xf32>
    %227 = vector.broadcast %206 : vector<1x32xf32> to vector<16x32xf32>
    %228 = arith.mulf %226, %227 : vector<16x32xf32>
    %229 = vector.broadcast %208 : vector<1x32xf32> to vector<16x32xf32>
    %230 = arith.addf %228, %229 : vector<16x32xf32>
    %c1_97 = arith.constant 1 : index
    %c0_98 = arith.constant 0 : index
    %c0_99 = arith.constant 0 : index
    %231 = vector.load %arg6[%c1_97, %c0_98, %c0_99] : memref<2x32x64xf32, #tpu.memory_space<vmem>>, vector<1x32x64xf32>
    %232 = vector.shape_cast %231 : vector<1x32x64xf32> to vector<32x64xf32>
    %cst_100 = arith.constant dense<0.000000e+00> : vector<16x64xf32>
    %233 = tpu.matmul %230, %232, %cst_100 {dimension_numbers = #tpu.dot_dimension_numbers<[1], [0], [0], [1], [0, 0, 1, 1], [], []>} : vector<16x32xf32>, vector<32x64xf32>, vector<16x64xf32> -> vector<16x64xf32>
    %c1_101 = arith.constant 1 : index
    %c0_102 = arith.constant 0 : index
    %c0_103 = arith.constant 0 : index
    %234 = vector.load %arg7[%c1_101, %c0_102, %c0_103] : memref<2x1x64xf32, #tpu.memory_space<vmem>>, vector<1x1x64xf32>
    %235 = vector.shape_cast %234 : vector<1x1x64xf32> to vector<1x64xf32>
    %236 = vector.broadcast %235 : vector<1x64xf32> to vector<16x64xf32>
    %237 = arith.addf %233, %236 : vector<16x64xf32>
    %cst_104 = arith.constant 0.000000e+00 : f32
    %238 = vector.broadcast %cst_104 : f32 to vector<16x64xf32>
    %239 = arith.maximumf %237, %238 : vector<16x64xf32>
    %c1_105 = arith.constant 1 : index
    %c0_106 = arith.constant 0 : index
    %c0_107 = arith.constant 0 : index
    %240 = vector.load %arg8[%c1_105, %c0_106, %c0_107] : memref<2x64x32xf32, #tpu.memory_space<vmem>>, vector<1x64x32xf32>
    %241 = vector.shape_cast %240 : vector<1x64x32xf32> to vector<64x32xf32>
    %cst_108 = arith.constant dense<0.000000e+00> : vector<16x32xf32>
    %242 = tpu.matmul %239, %241, %cst_108 {dimension_numbers = #tpu.dot_dimension_numbers<[1], [0], [0], [1], [0, 0, 1, 1], [], []>} : vector<16x64xf32>, vector<64x32xf32>, vector<16x32xf32> -> vector<16x32xf32>
    %c1_109 = arith.constant 1 : index
    %c0_110 = arith.constant 0 : index
    %c0_111 = arith.constant 0 : index
    %243 = vector.load %arg9[%c1_109, %c0_110, %c0_111] : memref<2x1x32xf32, #tpu.memory_space<vmem>>, vector<1x1x32xf32>
    %244 = vector.shape_cast %243 : vector<1x1x32xf32> to vector<1x32xf32>
    %245 = vector.broadcast %244 : vector<1x32xf32> to vector<16x32xf32>
    %246 = arith.addf %242, %245 : vector<16x32xf32>
    %247 = arith.addf %246, %230 : vector<16x32xf32>
    %c1_112 = arith.constant 1 : index
    %c0_113 = arith.constant 0 : index
    %c0_114 = arith.constant 0 : index
    %248 = vector.load %arg10[%c1_112, %c0_113, %c0_114] : memref<2x1x32xf32, #tpu.memory_space<vmem>>, vector<1x1x32xf32>
    %249 = vector.shape_cast %248 : vector<1x1x32xf32> to vector<1x32xf32>
    %c1_115 = arith.constant 1 : index
    %c0_116 = arith.constant 0 : index
    %c0_117 = arith.constant 0 : index
    %250 = vector.load %arg11[%c1_115, %c0_116, %c0_117] : memref<2x1x32xf32, #tpu.memory_space<vmem>>, vector<1x1x32xf32>
    %251 = vector.shape_cast %250 : vector<1x1x32xf32> to vector<1x32xf32>
    %cst_118 = arith.constant dense<0.000000e+00> : vector<16xf32>
    %252 = vector.multi_reduction <add>, %247, %cst_118 [1] : vector<16x32xf32> to vector<16xf32>
    %253 = vector.shape_cast %252 : vector<16xf32> to vector<16x1xf32>
    %cst_119 = arith.constant 3.200000e+01 : f32
    %254 = vector.broadcast %cst_119 : f32 to vector<16x1xf32>
    %255 = arith.divf %253, %254 : vector<16x1xf32>
    %256 = vector.broadcast %255 : vector<16x1xf32> to vector<16x32xf32>
    %257 = arith.subf %247, %256 : vector<16x32xf32>
    %258 = arith.mulf %257, %257 : vector<16x32xf32>
    %cst_120 = arith.constant dense<0.000000e+00> : vector<16xf32>
    %259 = vector.multi_reduction <add>, %258, %cst_120 [1] : vector<16x32xf32> to vector<16xf32>
    %260 = vector.shape_cast %259 : vector<16xf32> to vector<16x1xf32>
    %cst_121 = arith.constant 3.200000e+01 : f32
    %261 = vector.broadcast %cst_121 : f32 to vector<16x1xf32>
    %262 = arith.divf %260, %261 : vector<16x1xf32>
    %263 = vector.broadcast %255 : vector<16x1xf32> to vector<16x32xf32>
    %264 = arith.subf %247, %263 : vector<16x32xf32>
    %cst_122 = arith.constant 9.99999997E-7 : f32
    %265 = vector.broadcast %cst_122 : f32 to vector<16x1xf32>
    %266 = arith.addf %262, %265 : vector<16x1xf32>
    %267 = math.rsqrt %266 : vector<16x1xf32>
    %268 = vector.broadcast %267 : vector<16x1xf32> to vector<16x32xf32>
    %269 = arith.mulf %264, %268 : vector<16x32xf32>
    %270 = vector.broadcast %249 : vector<1x32xf32> to vector<16x32xf32>
    %271 = arith.mulf %269, %270 : vector<16x32xf32>
    %272 = vector.broadcast %251 : vector<1x32xf32> to vector<16x32xf32>
    %273 = arith.addf %271, %272 : vector<16x32xf32>
    %c0_123 = arith.constant 0 : index
    %c0_124 = arith.constant 0 : index
    %274 = vector.load %arg12[%c0_123, %c0_124] : memref<16x32xf32, #tpu.memory_space<vmem>>, vector<16x32xf32>
    tpu.vector_store %arg12[%c0_123, %c0_124], %273 {strides = array<i32>} : memref<16x32xf32, #tpu.memory_space<vmem>>, vector<16x32xf32>,
    return
  }
}

</mosaic_0001>

<bundles_post_ra>
// kernel: transformer_encoder.1
= control target key start
LH: loop header
LB: loop body
LE: loop exit
PB: predicated region body
PF: predicated region fallthrough
CT: control target
= control target key end

     0   :  { %17 = vsyncpa [#allocation3], 0  ;;  %s5100_s0 = inlined_call_operand.hbm [shape: f32[16,32], index: 0, kind: input, shape index: {}]   ;;  %s5101_s1 = inlined_call_operand.hbm [shape: f32[8,32], index: 1, kind: input, shape index: {}]   ;;  %s5102_s2 = inlined_call_operand.vmem [shape: f32[2,32,96], index: 2, kind: input, shape index: {}]   ;;  %s5103_s3 = inlined_call_operand.vmem [shape: f32[2,32,32], index: 3, kind: input, shape index: {}]   ;;  %s5104_s4 = inlined_call_operand.vmem [shape: f32[2,1,32], index: 4, kind: input, shape index: {}]   ;;  %s5105_s5 = inlined_call_operand.vmem [shape: f32[2,1,32], index: 5, kind: input, shape index: {}]   ;;  %s5106_s6 = inlined_call_operand.vmem [shape: f32[2,32,64], index: 6, kind: input, shape index: {}]   ;;  %s5107_s7 = inlined_call_operand.vmem [shape: f32[2,1,64], index: 7, kind: input, shape index: {}]   ;;  %s5108_s8 = inlined_call_operand.vmem [shape: f32[2,64,32], index: 8, kind: input, shape index: {}]   ;;  %s5109_s9 = inlined_call_operand.vmem [shape: f32[2,1,32], index: 9, kind: input, shape index: {}]   ;;  %s5110_s10 = inlined_call_operand.vmem [shape: f32[2,1,32], index: 10, kind: input, shape index: {}]   ;;  %s5111_s11 = inlined_call_operand.vmem [shape: f32[2,1,32], index: 11, kind: input, shape index: {}]   ;;  %s5112_s12 = inlined_call_operand.hbm [shape: f32[16,32], index: 12, kind: output, shape index: {}]  }
   0x1   :  { %18 = vsyncpa [#allocation6], 0 }
   0x2   :  { %19 = vsyncpa [#allocation4], 0  ;;  %s4443_s21 = smov [#allocation2]   ;;  %s4371_s25 = scalar_lea.hbm %s5100_s0, 256 }
   0x3   :  { %s25_s22 = sshll.u32 %s4443_s21, 4  ;;  %p4372_p0 = scmp.ne.s32.totalorder %s5100_s0, %s4371_s25  ;;  %s26_s22 = int_to_ptr.vmem [resolvable:$true] %s25_s22 }
   0x4   :  { %p4375_p1 = scmp.lt.u32.totalorder %s4371_s25, %s5100_s0 }
   0x6   :  { %p4377_p2 = pnand %p4375_p1, %p4372_p0 }
   0x8   :  { %4380 = shalt.err (!%p4377_p2)
}
   0x9   :  { %s4381_s30 = scalar_lea.vmem %s26_s22, 256  ;;  %p4386_p4 = scmp.lt.s32.totalorder %s26_s22, %s26_s22 }
   0xa   :  { %p4382_p3 = scmp.ne.s32.totalorder %s26_s22, %s4381_s30  ;;  %p4387_p5 = scmp.lt.s32.totalorder %s4381_s30, %s4381_s30 }
   0xc   :  { %p4388_p6 = por %p4387_p5, %p4386_p4 }
   0xe   :  { %p4389_p7 = pnand %p4388_p6, %p4382_p3 }
  0x10   :  { %4392 = shalt.err (!%p4389_p7)
}
  0x11   :  { %s5113_s13 = smov 128   ;;  %s5118_s14 = smov 8  }
  0x12   :  { %31 = dma.hbm_to_vmem [thread:$0]  %s5100_s0, 256, %s26_s22, [#allocation3], %s5113_s13, %s5113_s13, %s5118_s14  }
  0x13   :  { %s4446_s17 = smov [#allocation5]   ;;  %s4393_s21 = scalar_lea.hbm %s5101_s1, 128 }
  0x14   :  { %s38_s18 = sshll.u32 %s4446_s17, 4  ;;  %p4394_p8 = scmp.ne.s32.totalorder %s5101_s1, %s4393_s21  ;;  %s39_s18 = int_to_ptr.vmem [resolvable:$true] %s38_s18 }
  0x15   :  { %p4397_p9 = scmp.lt.u32.totalorder %s4393_s21, %s5101_s1 }
  0x17   :  { %p4399_p10 = pnand %p4397_p9, %p4394_p8 }
  0x19   :  { %4402 = shalt.err (!%p4399_p10)
}
  0x1a   :  { %s4403_s27 = scalar_lea.vmem %s39_s18, 128  ;;  %p4408_p12 = scmp.lt.s32.totalorder %s39_s18, %s39_s18 }
  0x1b   :  { %p4404_p11 = scmp.ne.s32.totalorder %s39_s18, %s4403_s27  ;;  %p4409_p13 = scmp.lt.s32.totalorder %s4403_s27, %s4403_s27 }
  0x1d   :  { %p4410_p0 = por %p4409_p13, %p4408_p12 }
  0x1f   :  { %p4411_p1 = pnand %p4410_p0, %p4404_p11 }
  0x21   :  { %4414 = shalt.err (!%p4411_p1)
}
  0x22   :  { %41 = dma.hbm_to_vmem [thread:$0]  %s5101_s1, 128, %s39_s18, [#allocation6]  }
  0x23   :  { %4437 = dma.done.wait [#allocation3], 256  }
  0x24   :  { %4438 = vsyncadd [#allocation3], 4294967040 }
  0x25   :  { %4439 = dma.done.wait [#allocation6], 128  }
  0x26   :  { %4440 = vsyncadd [#allocation6], 4294967168  ;;  %v73_v0 = vld [vmem:[%s5102_s2] sm:$0xff]  ;;  %v74_v1 = vld [vmem:[%s5102_s2 + $0x8] sm:$0xff]  ;;  %vm77_vm0 = vcmask 261120   ;;  %v4447_v11 = vmov 0.0  }
  0x27   :  { %v75_v2 = vld [vmem:[%s5102_s2 + $0x10] sm:$0xff]  ;;  %v4191_v3 = vpack.c.bf16 %v74_v1, %v73_v0  ;;  %v76_v4 = vld [vmem:[%s5102_s2 + $0x18] sm:$0xff]  ;;  %v68_v5 = vld [vmem:[#allocation2] sm:$0xff]  ;;  %3948 = vmatprep.subr.mxu0 %v4447_v11  ;;  %vm4448_vm1 = vmmov 0   ;;  %s4449_s1 = smov 96   ;;  %vm162_vm2 = vcmask 64512  }
  0x28   :  { %v4195_v6 = vpack.c.bf16 %v76_v4, %v75_v2  ;;  %v70_v7 = vld [vmem:[#allocation5] sm:$0xff]  ;;  %v69_v9 = vld [vmem:[#allocation2 + $0x8] sm:$0xff]  ;;  %3950 = vmatprep.mubr.msk.f32.mxu0 %vm4448_vm1, %v4447_v11  ;;  %s4450_s18 = smov 64   ;;  %s4451_s21 = smov 88   ;;  %vm1507_vm3 = vcmask 195584   ;;  %vm1504_vm4 = vcmask 130048  }
  0x29   :  { %4192 = vmatprep.subr.bf16.mxu1 %v4191_v3  ;;  %v4567_v8 = vadd.f32 %v70_v7, %v68_v5  ;;  %v4571_v10 = vadd.f32 %v70_v7, %v69_v9  ;;  %s4452_s23 = smov 120   ;;  %s4453_s24 = smov 56   ;;  %vm1749_vm5 = vcmask 523264  }
  0x2a   :  { %4194 = vmatpush3.bf16.msra.mxu1 %v4191_v3  ;;  %s4454_s25 = smov 80   ;;  %s4455_s26 = smov 112  }
  0x2b   :  { %4196 = vmatprep.subr.bf16.mxu1 %v4195_v6  ;;  %3935 = vmatprep.mubr.msk.f32.mxu1 %vm77_vm0, %v4567_v8  ;;  %s4456_s27 = smov 48   ;;  %s4457_s0 = smov 72  }
  0x2c   :  { %s4458_s22 = smov 104   ;;  %s5120_s28 = smov 40  }
  0x2d   :  { %s5114_s29 = smov 16   ;;  %s5116_s30 = smov 24  }
  0x2e   :  { %4198 = vmatpush3.bf16.msra.mxu1 %v4195_v6  ;;  %s5125_s17 = smov 24   ;;  %s4462_s15 = smov [#allocation7]  }
  0x2f   :  { %3938 = vmatprep.subr.mxu1 %v4447_v11 }
  0x31   :  { %3936 = vmatmul.mubr.msk.f32.vlgmr.msra.gmra.mrb[0].mxu1 %vm77_vm0, %v4571_v10 }
  0x32   :  { %3940 = vmatprep.mubr.msk.f32.mxu1 %vm4448_vm1, %v4447_v11 }
 0x104   :  { %v4581_v12 = vpop.f32.mrb[0].mxu1 }
 0x105   :  { %v4583_v13 = vpop.f32.mrb[1].mxu1 }
 0x106   :  { %160 = vrot.lane.b32.xlu0 %v4583_v13, %s4449_s1 }
 0x10a   :  { %238 = vrot.lane.b32.xlu0 %v4581_v12, %s4449_s1 }
 0x178   :  { %v161_v14 = vpop.permute.xlu0 %160 }
 0x179   :  { %3939 = vmatpush3.xpose.msk.msra.mxu1 %vm162_vm2, %v161_v14 }
 0x17a   :  { %3943 = vmatprep.subr.mxu1 %v4447_v11 }
 0x17c   :  { %3941 = vmatmul.mubr.msk.f32.vlgmr.msra.gmra.mrb[2].mxu1 %vm162_vm2, %v4583_v13  ;;  %v239_v15 = vpop.permute.xlu0 %238 }
 0x17d   :  { %3944 = vmatpush3.xpose.msk.msra.mxu1 %vm162_vm2, %v239_v15  ;;  %3945 = vmatprep.mubr.msk.f32.mxu1 %vm4448_vm1, %v4447_v11 }
 0x17e   :  { %3953 = vmatprep.subr.mxu1 %v4447_v11 }
 0x180   :  { %3946 = vmatmul.mubr.msk.f32.vlgmr.msra.gmra.mrb[4].mxu1 %vm162_vm2, %v4581_v12 }
 0x181   :  { %3955 = vmatprep.mubr.msk.f32.mxu1 %vm4448_vm1, %v4447_v11 }
 0x24f   :  { %v233_v16 = vpop.f32.mrb[2].mxu1 }
 0x250   :  { %v3942_v17 = vpop.f32.mrb[3].mxu1  ;;  %v314_v18 = vsel %vm162_vm2, %v233_v16, -inf }
 0x251   :  { %315 = vmax.xlane.f32.xlu1 %v314_v18 }
 0x253   :  { %v310_v19 = vpop.f32.mrb[4].mxu1 }
 0x254   :  { %v3947_v20 = vpop.f32.mrb[5].mxu1  ;;  %v317_v21 = vsel %vm162_vm2, %v310_v19, -inf }
 0x255   :  { %318 = vmax.xlane.f32.xlu1 %v317_v21 }
 0x266   :  { %336 = vrot.lane.b32.xlu1 %v4583_v13, %s4450_s18 }
 0x26a   :  { %412 = vrot.lane.b32.xlu1 %v4581_v12, %s4450_s18 }
 0x26e   :  { %490 = vrot.lane.b32.xlu1 %v4583_v13, %s4451_s21 }
 0x272   :  { %568 = vrot.lane.b32.xlu1 %v4581_v12, %s4451_s21 }
 0x2de   :  { %v316_v22 = vpop.xlane.xlu1 %315 }
 0x2df   :  { %v320_v23 = vsub.f32 %v233_v16, %v316_v22 }
 0x2e1   :  { %v322_v24 = vmul.f32 1.442695, %v320_v23 }
 0x2e2   :  { %v319_v25 = vpop.xlane.xlu1 %318 }
 0x2e3   :  { %4291 = vpow2.f32 %v322_v24  ;;  %v321_v26 = vsub.f32 %v310_v19, %v319_v25 }
 0x2e5   :  { %v324_v27 = vmul.f32 1.442695, %v321_v26 }
 0x2e6   :  { %v337_v28 = vpop.permute.xlu1 %336 }
 0x2e7   :  { %4293 = vpow2.f32 %v324_v27  ;;  %3949 = vmatpush3.msra.mxu0 %v337_v28 }
 0x2e8   :  { %3958 = vmatprep.subr.mxu0 %v4447_v11 }
 0x2ea   :  { %v413_v29 = vpop.permute.xlu1 %412 }
 0x2eb   :  { %3954 = vmatpush3.msra.mxu1 %v413_v29 }
 0x2ec   :  { %3963 = vmatprep.subr.mxu1 %v4447_v11 }
 0x2ed   :  { %v4292_v30 = vpop.eup %4291 }
 0x2ee   :  { %v326_v31 = vsel %vm162_vm2, %v4292_v30, 0.0  ;;  %v491_v34 = vpop.permute.xlu1 %490 }
 0x2ef   :  { %327 = vadd.xlane.f32.xlu0 %v326_v31 }
 0x2f1   :  { %v4294_v32 = vpop.eup %4293 }
 0x2f2   :  { %v329_v33 = vsel %vm162_vm2, %v4294_v32, 0.0  ;;  %v569_v35 = vpop.permute.xlu1 %568 }
 0x2f3   :  { %330 = vadd.xlane.f32.xlu1 %v329_v33 }
 0x304   :  { %566 = vrot.lane.b32.xlu1 %v4581_v12, %s4452_s23 }
 0x305   :  { %488 = vrot.lane.b32.xlu0 %v4583_v13, %s4452_s23 }
 0x37c   :  { %v328_v36 = vpop.xlane.xlu0 %327 }
 0x37d   :  { %4295 = vrcp.f32 %v328_v36 }
 0x380   :  { %v331_v37 = vpop.xlane.xlu1 %330  ;;  %v489_v42 = vpop.permute.xlu0 %488 }
 0x381   :  { %4297 = vrcp.f32 %v331_v37 }
 0x384   :  { %v567_v43 = vpop.permute.xlu1 %566 }
 0x387   :  { %v4296_v38 = vpop.eup %4295 }
 0x388   :  { %v333_v39 = vmul.f32 %v4296_v38, %v4292_v30 }
 0x38a   :  { %3951 = vmatmul.mubr.msk.f32.vlgmr.msra.gmra.mrb[0].mxu0 %vm162_vm2, %v333_v39 }
 0x38b   :  { %v4298_v40 = vpop.eup %4297  ;;  %3959 = vmatpush3.xpose.msk.msra.mxu0 %vm162_vm2, %v491_v34  ;;  %3960 = vmatprep.mubr.msk.f32.mxu0 %vm4448_vm1, %v4447_v11 }
 0x38c   :  { %v335_v41 = vmul.f32 %v4298_v40, %v4294_v32  ;;  %3968 = vmatprep.subr.mxu0 %v4447_v11 }
 0x38e   :  { %3956 = vmatmul.mubr.msk.f32.vlgmr.msra.gmra.mrb[6].mxu1 %vm162_vm2, %v335_v41  ;;  %3961 = vmatmul.mubr.msk.f32.vlgmr.msra.gmra.mrb[2].mxu0 %vm162_vm2, %v489_v42 }
 0x38f   :  { %3964 = vmatpush3.xpose.msk.msra.mxu1 %vm162_vm2, %v569_v35  ;;  %3965 = vmatprep.mubr.msk.f32.mxu1 %vm4448_vm1, %v4447_v11 }
 0x390   :  { %3973 = vmatprep.subr.mxu1 %v4447_v11  ;;  %3970 = vmatprep.mubr.msk.f32.mxu0 %vm4448_vm1, %v4447_v11 }
 0x392   :  { %3966 = vmatmul.mubr.msk.f32.vlgmr.msra.gmra.mrb[8].mxu1 %vm162_vm2, %v567_v43 }
 0x393   :  { %3975 = vmatprep.mubr.msk.f32.mxu1 %vm4448_vm1, %v4447_v11 }
 0x45d   :  { %v4635_v44 = vpop.f32.mrb[0].mxu0 }
 0x45e   :  { %v3952_v45 = vpop.f32.mrb[1].mxu0 }
 0x461   :  { %v4637_v46 = vpop.f32.mrb[6].mxu1  ;;  %v562_v47 = vpop.f32.mrb[2].mxu0 }
 0x462   :  { %v3957_v48 = vpop.f32.mrb[7].mxu1  ;;  %v3962_v49 = vpop.f32.mrb[3].mxu0  ;;  %v644_v50 = vsel %vm162_vm2, %v562_v47, -inf }
 0x463   :  { %645 = vmax.xlane.f32.xlu1 %v644_v50 }
 0x465   :  { %v640_v51 = vpop.f32.mrb[8].mxu1 }
 0x466   :  { %v3967_v52 = vpop.f32.mrb[9].mxu1  ;;  %v647_v53 = vsel %vm162_vm2, %v640_v51, -inf }
 0x467   :  { %648 = vmax.xlane.f32.xlu0 %v647_v53 }
 0x474   :  { %666 = vrot.lane.b32.xlu1 %v4583_v13, %s4453_s24 }
 0x478   :  { %820 = vrot.lane.b32.xlu1 %v4583_v13, %s4454_s25 }
 0x47c   :  { %898 = vrot.lane.b32.xlu1 %v4581_v12, %s4454_s25 }
 0x47d   :  { %742 = vrot.lane.b32.xlu0 %v4581_v12, %s4453_s24 }
 0x481   :  { %818 = vrot.lane.b32.xlu0 %v4583_v13, %s4455_s26 }
 0x4f0   :  { %v646_v54 = vpop.xlane.xlu1 %645 }
 0x4f1   :  { %v650_v55 = vsub.f32 %v562_v47, %v646_v54 }
 0x4f3   :  { %v652_v56 = vmul.f32 1.442695, %v650_v55 }
 0x4f4   :  { %v667_v57 = vpop.permute.xlu1 %666  ;;  %v649_v58 = vpop.xlane.xlu0 %648 }
 0x4f5   :  { %4299 = vpow2.f32 %v652_v56  ;;  %v651_v59 = vsub.f32 %v640_v51, %v649_v58  ;;  %3969 = vmatpush3.msra.mxu0 %v667_v57 }
 0x4f6   :  { %3978 = vmatprep.subr.mxu0 %v4447_v11 }
 0x4f7   :  { %v654_v60 = vmul.f32 1.442695, %v651_v59 }
 0x4f8   :  { %v743_v61 = vpop.permute.xlu0 %742  ;;  %v821_v2 = vpop.permute.xlu1 %820 }
 0x4f9   :  { %4301 = vpow2.f32 %v654_v60  ;;  %3974 = vmatpush3.msra.mxu1 %v743_v61 }
 0x4fa   :  { %3983 = vmatprep.subr.mxu1 %v4447_v11 }
 0x4fc   :  { %v899_v3 = vpop.permute.xlu1 %898  ;;  %v819_v15 = vpop.permute.xlu0 %818 }
 0x4ff   :  { %v4300_v62 = vpop.eup %4299 }
 0x500   :  { %v656_v63 = vsel %vm162_vm2, %v4300_v62, 0.0 }
 0x501   :  { %657 = vadd.xlane.f32.xlu1 %v656_v63 }
 0x503   :  { %v4302_v0 = vpop.eup %4301 }
 0x504   :  { %v659_v1 = vsel %vm162_vm2, %v4302_v0, 0.0 }
 0x505   :  { %660 = vadd.xlane.f32.xlu1 %v659_v1 }
 0x516   :  { %896 = vrot.lane.b32.xlu1 %v4581_v12, %s4455_s26 }
 0x58e   :  { %v658_v4 = vpop.xlane.xlu1 %657 }
 0x58f   :  { %4303 = vrcp.f32 %v658_v4 }
 0x592   :  { %v661_v5 = vpop.xlane.xlu1 %660 }
 0x593   :  { %4305 = vrcp.f32 %v661_v5 }
 0x596   :  { %v897_v16 = vpop.permute.xlu1 %896 }
 0x599   :  { %v4304_v6 = vpop.eup %4303 }
 0x59a   :  { %v663_v7 = vmul.f32 %v4304_v6, %v4300_v62 }
 0x59c   :  { %3971 = vmatmul.mubr.msk.f32.vlgmr.msra.gmra.mrb[4].mxu0 %vm162_vm2, %v663_v7 }
 0x59d   :  { %v4306_v9 = vpop.eup %4305  ;;  %3979 = vmatpush3.xpose.msk.msra.mxu0 %vm162_vm2, %v821_v2  ;;  %3980 = vmatprep.mubr.msk.f32.mxu0 %vm4448_vm1, %v4447_v11 }
 0x59e   :  { %v665_v14 = vmul.f32 %v4306_v9, %v4302_v0  ;;  %3988 = vmatprep.subr.mxu0 %v4447_v11 }
 0x5a0   :  { %3976 = vmatmul.mubr.msk.f32.vlgmr.msra.gmra.mrb[10].mxu1 %vm162_vm2, %v665_v14  ;;  %3981 = vmatmul.mubr.msk.f32.vlgmr.msra.gmra.mrb[6].mxu0 %vm162_vm2, %v819_v15 }
 0x5a1   :  { %3984 = vmatpush3.xpose.msk.msra.mxu1 %vm162_vm2, %v899_v3  ;;  %3985 = vmatprep.mubr.msk.f32.mxu1 %vm4448_vm1, %v4447_v11 }
 0x5a2   :  { %3993 = vmatprep.subr.mxu1 %v4447_v11  ;;  %3990 = vmatprep.mubr.msk.f32.mxu0 %vm4448_vm1, %v4447_v11 }
 0x5a4   :  { %3986 = vmatmul.mubr.msk.f32.vlgmr.msra.gmra.mrb[12].mxu1 %vm162_vm2, %v897_v16 }
 0x5a5   :  { %3995 = vmatprep.mubr.msk.f32.mxu1 %vm4448_vm1, %v4447_v11 }
 0x66f   :  { %v4673_v17 = vpop.f32.mrb[4].mxu0 }
 0x670   :  { %v3972_v18 = vpop.f32.mrb[5].mxu0 }
 0x673   :  { %v4675_v19 = vpop.f32.mrb[10].mxu1  ;;  %v892_v20 = vpop.f32.mrb[6].mxu0 }
 0x674   :  { %v3977_v21 = vpop.f32.mrb[11].mxu1  ;;  %v3982_v22 = vpop.f32.mrb[7].mxu0  ;;  %v974_v23 = vsel %vm162_vm2, %v892_v20, -inf }
 0x675   :  { %975 = vmax.xlane.f32.xlu0 %v974_v23  ;;  %v1512_v21 = vld [vmem:[%s5103_s3 + $0x10] sm:$0xff]  ;;  %v1513_v22 = vld [vmem:[%s5103_s3 + $0x18] sm:$0xff] }
 0x676   :  { %v4203_v23 = vpack.c.bf16 %v1513_v22, %v1512_v21 }
 0x677   :  { %v970_v24 = vpop.f32.mrb[12].mxu1 }
 0x678   :  { %v3987_v25 = vpop.f32.mrb[13].mxu1  ;;  %v977_v26 = vsel %vm162_vm2, %v970_v24, -inf }
 0x679   :  { %978 = vmax.xlane.f32.xlu1 %v977_v26 }
 0x68a   :  { %996 = vrot.lane.b32.xlu1 %v4583_v13, %s4456_s27 }
 0x68b   :  { %1072 = vrot.lane.b32.xlu0 %v4581_v12, %s4456_s27 }
 0x68e   :  { %1150 = vrot.lane.b32.xlu1 %v4583_v13, %s4457_s0 }
 0x692   :  { %1228 = vrot.lane.b32.xlu1 %v4581_v12, %s4457_s0 }
 0x696   :  { %1226 = vrot.lane.b32.xlu1 %v4581_v12, %s4458_s22 }
 0x702   :  { %v976_v27 = vpop.xlane.xlu0 %975 }
 0x703   :  { %v980_v28 = vsub.f32 %v892_v20, %v976_v27 }
 0x705   :  { %v982_v29 = vmul.f32 1.442695, %v980_v28 }
 0x706   :  { %v979_v30 = vpop.xlane.xlu1 %978  ;;  %v1073_v31 = vpop.permute.xlu0 %1072 }
 0x707   :  { %4307 = vpow2.f32 %v982_v29  ;;  %v981_v32 = vsub.f32 %v970_v24, %v979_v30  ;;  %3994 = vmatpush3.msra.mxu1 %v1073_v31 }
 0x708   :  { %4003 = vmatprep.subr.mxu1 %v4447_v11 }
 0x709   :  { %v984_v33 = vmul.f32 1.442695, %v981_v32 }
 0x70a   :  { %v997_v34 = vpop.permute.xlu1 %996 }
 0x70b   :  { %4309 = vpow2.f32 %v984_v33  ;;  %3989 = vmatpush3.msra.mxu0 %v997_v34 }
 0x70c   :  { %3998 = vmatprep.subr.mxu0 %v4447_v11 }
 0x70e   :  { %v1151_v41 = vpop.permute.xlu1 %1150 }
 0x711   :  { %v4308_v35 = vpop.eup %4307 }
 0x712   :  { %v986_v36 = vsel %vm162_vm2, %v4308_v35, 0.0  ;;  %v1229_v47 = vpop.permute.xlu1 %1228 }
 0x713   :  { %987 = vadd.xlane.f32.xlu0 %v986_v36 }
 0x715   :  { %v4310_v37 = vpop.eup %4309 }
 0x716   :  { %v989_v38 = vsel %vm162_vm2, %v4310_v37, 0.0  ;;  %v1227_v50 = vpop.permute.xlu1 %1226 }
 0x717   :  { %990 = vadd.xlane.f32.xlu0 %v989_v38 }
 0x72d   :  { %1148 = vrot.lane.b32.xlu0 %v4583_v13, %s4458_s22 }
 0x7a0   :  { %v988_v39 = vpop.xlane.xlu0 %987 }
 0x7a1   :  { %4311 = vrcp.f32 %v988_v39 }
 0x7a4   :  { %v991_v40 = vpop.xlane.xlu0 %990 }
 0x7a5   :  { %4313 = vrcp.f32 %v991_v40 }
 0x7a8   :  { %v1149_v49 = vpop.permute.xlu0 %1148 }
 0x7ab   :  { %v4312_v42 = vpop.eup %4311 }
 0x7ac   :  { %v993_v43 = vmul.f32 %v4312_v42, %v4308_v35 }
 0x7ae   :  { %3991 = vmatmul.mubr.msk.f32.vlgmr.msra.gmra.mrb[8].mxu0 %vm162_vm2, %v993_v43 }
 0x7af   :  { %v4314_v45 = vpop.eup %4313  ;;  %3999 = vmatpush3.xpose.msk.msra.mxu0 %vm162_vm2, %v1151_v41  ;;  %4000 = vmatprep.mubr.msk.f32.mxu0 %vm4448_vm1, %v4447_v11 }
 0x7b0   :  { %v995_v48 = vmul.f32 %v4314_v45, %v4310_v37  ;;  %4008 = vmatprep.subr.mxu0 %v4447_v11 }
 0x7b2   :  { %3996 = vmatmul.mubr.msk.f32.vlgmr.msra.gmra.mrb[14].mxu1 %vm162_vm2, %v995_v48  ;;  %4001 = vmatmul.mubr.msk.f32.vlgmr.msra.gmra.mrb[10].mxu0 %vm162_vm2, %v1149_v49 }
 0x7b3   :  { %4004 = vmatpush3.xpose.msk.msra.mxu1 %vm162_vm2, %v1229_v47  ;;  %4005 = vmatprep.mubr.msk.f32.mxu1 %vm4448_vm1, %v4447_v11 }
 0x7b4   :  { %4013 = vmatprep.subr.mxu1 %v4447_v11  ;;  %4010 = vmatprep.mubr.msk.f32.mxu0 %vm4448_vm1, %v4447_v11 }
 0x7b6   :  { %4006 = vmatmul.mubr.msk.f32.vlgmr.msra.gmra.mrb[16].mxu1 %vm162_vm2, %v1227_v50 }
 0x7b7   :  { %4015 = vmatprep.mubr.msk.f32.mxu1 %vm4448_vm1, %v4447_v11 }
 0x881   :  { %v1068_v51 = vpop.f32.mrb[8].mxu0 }
 0x882   :  { %v3992_v52 = vpop.f32.mrb[9].mxu0 }
 0x885   :  { %v1144_v53 = vpop.f32.mrb[14].mxu1  ;;  %v1222_v54 = vpop.f32.mrb[10].mxu0 }
 0x886   :  { %v3997_v55 = vpop.f32.mrb[15].mxu1  ;;  %v4002_v56 = vpop.f32.mrb[11].mxu0  ;;  %v1304_v57 = vsel %vm162_vm2, %v1222_v54, -inf }
 0x887   :  { %1305 = vmax.xlane.f32.xlu0 %v1304_v57  ;;  %v1641_v55 = vld [vmem:[%s5106_s6 + $0x8] sm:$0xff]  ;;  %v1642_v57 = vld [vmem:[%s5106_s6 + $0x10] sm:$0xff] }
 0x889   :  { %v1300_v58 = vpop.f32.mrb[16].mxu1 }
 0x88a   :  { %v4007_v59 = vpop.f32.mrb[17].mxu1  ;;  %v1307_v60 = vsel %vm162_vm2, %v1300_v58, -inf }
 0x88b   :  { %1308 = vmax.xlane.f32.xlu1 %v1307_v60  ;;  %v1734_v60 = vld [vmem:[%s5108_s8] sm:$0xff] }
 0x89c   :  { %1326 = vrot.lane.b32.xlu1 %v4583_v13, %s5120_s28 }
 0x8a0   :  { %1480 = vrot.lane.b32.xlu1 %v4673_v17, %s5118_s14 }
 0x8a4   :  { %1482 = vrot.lane.b32.xlu1 %v4675_v19, %s5118_s14  ;;  %v1511_v19 = vld [vmem:[%s5103_s3 + $0x8] sm:$0xff] }
 0x8a8   :  { %1490 = vrot.lane.b32.xlu1 %v1144_v53, %s5114_s29 }
 0x914   :  { %v1306_v61 = vpop.xlane.xlu0 %1305 }
 0x915   :  { %v1310_v62 = vsub.f32 %v1222_v54, %v1306_v61  ;;  %v1735_v61 = vld [vmem:[%s5108_s8 + $0x8] sm:$0xff] }
 0x917   :  { %v1312_v63 = vmul.f32 1.442695, %v1310_v62  ;;  %v1736_v62 = vld [vmem:[%s5108_s8 + $0x10] sm:$0xff] }
 0x918   :  { %v1309_v0 = vpop.xlane.xlu1 %1308 }
 0x919   :  { %4315 = vpow2.f32 %v1312_v63  ;;  %v1311_v1 = vsub.f32 %v1300_v58, %v1309_v0  ;;  %v1643_v58 = vld [vmem:[%s5106_s6 + $0x18] sm:$0xff]  ;;  %v4215_v63 = vpack.c.bf16 %v1735_v61, %v1734_v60 }
 0x91a   :  { %v4211_v59 = vpack.c.bf16 %v1643_v58, %v1642_v57  ;;  %v1737_v0 = vld [vmem:[%s5108_s8 + $0x18] sm:$0xff] }
 0x91b   :  { %v1314_v2 = vmul.f32 1.442695, %v1311_v1  ;;  %v4219_v1 = vpack.c.bf16 %v1737_v0, %v1736_v62  ;;  %v3741_v0 = vld [vmem:[%s5110_s10] ss:$0 sm:$0xff] }
 0x91c   :  { %v1327_v3 = vpop.permute.xlu1 %1326 }
 0x91d   :  { %4317 = vpow2.f32 %v1314_v2  ;;  %4009 = vmatpush3.msra.mxu0 %v1327_v3  ;;  %v1738_v2 = vld [vmem:[%s5108_s8 + $0x20] sm:$0xff]  ;;  %v1739_v3 = vld [vmem:[%s5108_s8 + $0x28] sm:$0xff] }
 0x920   :  { %v1481_v28 = vpop.permute.xlu1 %1480 }
 0x921   :  { %v1502_v31 = vsel %vm162_vm2, %v4635_v44, %v1481_v28 }
 0x923   :  { %v4316_v13 = vpop.eup %4315 }
 0x924   :  { %v1316_v4 = vsel %vm162_vm2, %v4316_v13, 0.0  ;;  %v1483_v29 = vpop.permute.xlu1 %1482 }
 0x925   :  { %1317 = vadd.xlane.f32.xlu0 %v1316_v4  ;;  %v1503_v36 = vsel %vm162_vm2, %v4637_v46, %v1483_v29 }
 0x927   :  { %v4318_v5 = vpop.eup %4317 }
 0x928   :  { %v1319_v6 = vsel %vm162_vm2, %v4318_v5, 0.0  ;;  %v1491_v32 = vpop.permute.xlu1 %1490 }
 0x929   :  { %1320 = vadd.xlane.f32.xlu0 %v1319_v6  ;;  %v1506_v37 = vsel %vm1504_vm4, %v1503_v36, %v1491_v32 }
 0x93f   :  { %1402 = vrot.lane.b32.xlu0 %v4581_v12, %s5120_s28  ;;  %v1510_v12 = vld [vmem:[%s5103_s3] sm:$0xff] }
 0x940   :  { %v4199_v20 = vpack.c.bf16 %v1511_v19, %v1510_v12 }
 0x942   :  { %4200 = vmatprep.subr.bf16.mxu0 %v4199_v20 }
 0x943   :  { %1488 = vrot.lane.b32.xlu0 %v1068_v51, %s5114_s29 }
 0x9b2   :  { %v1318_v7 = vpop.xlane.xlu0 %1317 }
 0x9b3   :  { %4319 = vrcp.f32 %v1318_v7 }
 0x9b6   :  { %v1321_v9 = vpop.xlane.xlu0 %1320 }
 0x9b7   :  { %4321 = vrcp.f32 %v1321_v9 }
 0x9ba   :  { %v1403_v14 = vpop.permute.xlu0 %1402 }
 0x9bb   :  { %4014 = vmatpush3.msra.mxu1 %v1403_v14 }
 0x9bd   :  { %v4320_v15 = vpop.eup %4319 }
 0x9be   :  { %v1323_v16 = vmul.f32 %v4320_v15, %v4316_v13  ;;  %v1489_v30 = vpop.permute.xlu0 %1488  ;;  %v4223_v13 = vpack.c.bf16 %v1739_v3, %v1738_v2 }
 0x9bf   :  { %v1505_v33 = vsel %vm1504_vm4, %v1502_v31, %v1489_v30 }
 0x9c0   :  { %4011 = vmatmul.mubr.msk.f32.vlgmr.msra.gmra.mrb[12].mxu0 %vm162_vm2, %v1323_v16  ;;  %v3733_v16 = vld [vmem:[%s5104_s4] ss:$0 sm:$0xff] }
 0x9c1   :  { %v4322_v17 = vpop.eup %4321  ;;  %4202 = vmatpush3.bf16.msra.mxu0 %v4199_v20 }
 0x9c2   :  { %v1325_v18 = vmul.f32 %v4322_v17, %v4318_v5  ;;  %4204 = vmatprep.subr.bf16.mxu0 %v4203_v23 }
 0x9c4   :  { %4016 = vmatmul.mubr.msk.f32.vlgmr.msra.gmra.mrb[18].mxu1 %vm162_vm2, %v1325_v18  ;;  %v3734_v18 = vld [vmem:[%s5105_s5] ss:$0 sm:$0xff] }
 0x9c5   :  { %4206 = vmatpush3.bf16.msra.mxu0 %v4203_v23 }
 0x9c6   :  { %4216 = vmatprep.subr.bf16.mxu0 %v4215_v63 }
 0xa93   :  { %v1398_v24 = vpop.f32.mrb[12].mxu0 }
 0xa94   :  { %1496 = vrot.lane.b32.xlu0 %v1398_v24, %s5116_s30  ;;  %v4012_v25 = vpop.f32.mrb[13].mxu0  ;;  %v1740_v24 = vld [vmem:[%s5108_s8 + $0x30] sm:$0xff] }
 0xa95   :  { %v1741_v25 = vld [vmem:[%s5108_s8 + $0x38] sm:$0xff] }
 0xa97   :  { %v1474_v26 = vpop.f32.mrb[18].mxu1 }
 0xa98   :  { %1498 = vrot.lane.b32.xlu1 %v1474_v26, %s5116_s30  ;;  %v4017_v27 = vpop.f32.mrb[19].mxu1  ;;  %v4227_v26 = vpack.c.bf16 %v1741_v25, %v1740_v24 }
 0xa99   :  { %v3735_v27 = vld [vmem:[%s5107_s7] ss:$0 sm:$0xff] }
 0xb06   :  { %v1497_v34 = vpop.permute.xlu0 %1496 }
 0xb07   :  { %v1508_v35 = vsel %vm1507_vm3, %v1505_v33, %v1497_v34  ;;  %v3738_v34 = vld [vmem:[%s5109_s9] ss:$0 sm:$0xff] }
 0xb08   :  { %4026 = vmatprep.mubr.msk.f32.mxu0 %vm77_vm0, %v1508_v35 }
 0xb0a   :  { %v1499_v38 = vpop.permute.xlu1 %1498 }
 0xb0b   :  { %v1509_v39 = vsel %vm1507_vm3, %v1506_v37, %v1499_v38 }
 0xb0c   :  { %4027 = vmatmul.mubr.msk.f32.vlgmr.msra.gmra.mrb[14].mxu0 %vm77_vm0, %v1509_v39 }
 0xb0d   :  { %4218 = vmatpush3.bf16.msra.mxu0 %v4215_v63 }
 0xb0e   :  { %4220 = vmatprep.subr.bf16.mxu0 %v4219_v1 }
 0xb11   :  { %4222 = vmatpush3.bf16.msra.mxu0 %v4219_v1 }
 0xb12   :  { %4224 = vmatprep.subr.bf16.mxu0 %v4223_v13 }
 0xb15   :  { %4226 = vmatpush3.bf16.msra.mxu0 %v4223_v13  ;;  %v3742_v13 = vld [vmem:[%s5111_s11] ss:$0 sm:$0xff] }
 0xb16   :  { %4228 = vmatprep.subr.bf16.mxu0 %v4227_v26 }
 0xb19   :  { %4230 = vmatpush3.bf16.msra.mxu0 %v4227_v26 }
 0xb1a   :  { %4080 = vmatprep.subr.mxu0 %v4447_v11 }
 0xbdf   :  { %v4028_v44 = vpop.f32.mrb[14].mxu0 }
 0xbe0   :  { %v1592_v40 = vadd.f32 %v4028_v44, %v4571_v10  ;;  %v1586_v41 = vpop.f32.mrb[15].mxu0 }
 0xbe1   :  { %v1587_v42 = vadd.f32 %v1586_v41, %v4567_v8  ;;  %v1640_v8 = vld [vmem:[%s5106_s6] sm:$0xff] }
 0xbe2   :  { %v1600_v43 = vsel %vm77_vm0, %v1592_v40, 0.0  ;;  %v4207_v56 = vpack.c.bf16 %v1641_v55, %v1640_v8  ;;  %v3745_v8 = vld [vmem:[%s5102_s2 + $0x30] sm:$0xff]  ;;  %v3746_v55 = vld [vmem:[%s5102_s2 + $0x38] sm:$0xff] }
 0xbe3   :  { %1601 = vadd.xlane.f32.xlu1 %v1600_v43  ;;  %v1597_v45 = vsel %vm77_vm0, %v1587_v42, 0.0 }
 0xbe4   :  { %1598 = vadd.xlane.f32.xlu0 %v1597_v45  ;;  %4208 = vmatprep.subr.bf16.mxu1 %v4207_v56 }
 0xbe5   :  { %4210 = vmatpush3.bf16.msra.mxu1 %v4207_v56  ;;  %v4235_v56 = vpack.c.bf16 %v3746_v55, %v3745_v8 }
 0xbe6   :  { %4212 = vmatprep.subr.bf16.mxu1 %v4211_v59 }
 0xbe9   :  { %4214 = vmatpush3.bf16.msra.mxu1 %v4211_v59 }
 0xc70   :  { %v1602_v46 = vpop.xlane.xlu1 %1601 }
 0xc71   :  { %v1605_v47 = vmul.f32 0.03125, %v1602_v46  ;;  %v1599_v48 = vpop.xlane.xlu0 %1598 }
 0xc72   :  { %v1604_v49 = vmul.f32 0.03125, %v1599_v48 }
 0xc73   :  { %v1607_v50 = vsub.f32 %v1592_v40, %v1605_v47 }
 0xc74   :  { %v1606_v51 = vsub.f32 %v1587_v42, %v1604_v49 }
 0xc75   :  { %v1609_v54 = vmul.f32 %v1607_v50, %v1607_v50 }
 0xc76   :  { %v1608_v52 = vmul.f32 %v1606_v51, %v1606_v51 }
 0xc77   :  { %v1613_v10 = vsel %vm77_vm0, %v1609_v54, 0.0  ;;  %v3744_v54 = vld [vmem:[%s5102_s2 + $0x28] sm:$0xff] }
 0xc78   :  { %v1610_v53 = vsel %vm77_vm0, %v1608_v52, 0.0 }
 0xc79   :  { %1611 = vadd.xlane.f32.xlu0 %v1610_v53  ;;  %v3743_v53 = vld [vmem:[%s5102_s2 + $0x20] sm:$0xff] }
 0xc7d   :  { %1614 = vadd.xlane.f32.xlu0 %v1613_v10  ;;  %v4231_v10 = vpack.c.bf16 %v3744_v54, %v3743_v53 }
 0xc7f   :  { %4232 = vmatprep.subr.bf16.mxu1 %v4231_v10 }
 0xd06   :  { %v1612_v4 = vpop.xlane.xlu0 %1611 }
 0xd07   :  { %v1616_v5 = vmul.f32 0.03125, %v1612_v4 }
 0xd09   :  { %v1618_v6 = vadd.f32 1e-06, %v1616_v5 }
 0xd0a   :  { %v1615_v7 = vpop.xlane.xlu0 %1614 }
 0xd0b   :  { %4323 = vrsqrt.f32 %v1618_v6  ;;  %v1617_v9 = vmul.f32 0.03125, %v1615_v7 }
 0xd0d   :  { %v1619_v14 = vadd.f32 1e-06, %v1617_v9 }
 0xd0f   :  { %4325 = vrsqrt.f32 %v1619_v14 }
 0xd15   :  { %v4324_v15 = vpop.eup %4323 }
 0xd16   :  { %v1622_v17 = vmul.f32 %v4324_v15, %v1606_v51 }
 0xd18   :  { %v1630_v12 = vmul.f32 %v3733_v16, %v1622_v17 }
 0xd19   :  { %v4326_v19 = vpop.eup %4325 }
 0xd1a   :  { %v1623_v20 = vmul.f32 %v4326_v19, %v1607_v50  ;;  %v1638_v21 = vadd.f32 %v3734_v18, %v1630_v12 }
 0xd1c   :  { %v1631_v22 = vmul.f32 %v3733_v16, %v1623_v20  ;;  %4037 = vmatprep.mubr.msk.f32.mxu1 %vm77_vm0, %v1638_v21 }
 0xd1e   :  { %v1639_v23 = vadd.f32 %v3734_v18, %v1631_v22 }
 0xd20   :  { %4038 = vmatmul.mubr.msk.f32.vlgmr.msra.gmra.mrb[20].mxu1 %vm77_vm0, %v1639_v23 }
 0xd21   :  { %4234 = vmatpush3.bf16.msra.mxu1 %v4231_v10 }
 0xd22   :  { %4236 = vmatprep.subr.bf16.mxu1 %v4235_v56 }
 0xd25   :  { %4238 = vmatpush3.bf16.msra.mxu1 %v4235_v56 }
 0xd26   :  { %4070 = vmatprep.subr.mxu1 %v4447_v11 }
 0xdf3   :  { %v4039_v28 = vpop.f32.mrb[20].mxu1 }
 0xdf4   :  { %v1729_v29 = vadd.f32 %v4039_v28, %v3735_v27  ;;  %v1723_v30 = vpop.f32.mrb[21].mxu1 }
 0xdf5   :  { %v1724_v31 = vadd.f32 %v3735_v27, %v1723_v30 }
 0xdf6   :  { %v1733_v33 = vmax.f32 %v1729_v29, 0.0 }
 0xdf7   :  { %v1732_v32 = vmax.f32 %v1724_v31, 0.0 }
 0xdf9   :  { %4056 = vmatprep.mubr.msk.f32.mxu0 %vm1749_vm5, %v1732_v32 }
 0xdfa   :  { %4057 = vmatmul.mubr.msk.f32.vlgmr.msra.gmra.mrb[16].mxu0 %vm1749_vm5, %v1733_v33 }
 0xdfb   :  { %4082 = vmatprep.mubr.msk.f32.mxu0 %vm4448_vm1, %v4447_v11 }
 0xecd   :  { %v4058_v35 = vpop.f32.mrb[16].mxu0 }
 0xece   :  { %v1828_v36 = vadd.f32 %v4058_v35, %v3738_v34  ;;  %v1822_v37 = vpop.f32.mrb[17].mxu0 }
 0xecf   :  { %v1823_v38 = vadd.f32 %v3738_v34, %v1822_v37 }
 0xed0   :  { %v1832_v39 = vadd.f32 %v1828_v36, %v1639_v23 }
 0xed1   :  { %v1831_v44 = vadd.f32 %v1823_v38, %v1638_v21 }
 0xed2   :  { %v1838_v40 = vsel %vm77_vm0, %v1832_v39, 0.0 }
 0xed3   :  { %1839 = vadd.xlane.f32.xlu0 %v1838_v40  ;;  %v1835_v41 = vsel %vm77_vm0, %v1831_v44, 0.0 }
 0xed4   :  { %1836 = vadd.xlane.f32.xlu1 %v1835_v41 }
 0xf60   :  { %v1840_v42 = vpop.xlane.xlu0 %1839 }
 0xf61   :  { %v1842_v43 = vmul.f32 0.03125, %v1840_v42  ;;  %v1837_v45 = vpop.xlane.xlu1 %1836 }
 0xf62   :  { %v1841_v46 = vmul.f32 0.03125, %v1837_v45 }
 0xf63   :  { %v1844_v47 = vsub.f32 %v1832_v39, %v1842_v43 }
 0xf64   :  { %v1843_v48 = vsub.f32 %v1831_v44, %v1841_v46 }
 0xf65   :  { %v1846_v49 = vmul.f32 %v1844_v47, %v1844_v47 }
 0xf66   :  { %v1845_v50 = vmul.f32 %v1843_v48, %v1843_v48 }
 0xf67   :  { %v1850_v51 = vsel %vm77_vm0, %v1846_v49, 0.0 }
 0xf68   :  { %1851 = vadd.xlane.f32.xlu0 %v1850_v51  ;;  %v1847_v52 = vsel %vm77_vm0, %v1845_v50, 0.0 }
 0xf69   :  { %1848 = vadd.xlane.f32.xlu1 %v1847_v52 }
 0xff5   :  { %v1852_v57 = vpop.xlane.xlu0 %1851 }
 0xff6   :  { %v1854_v58 = vmul.f32 0.03125, %v1852_v57  ;;  %v1849_v59 = vpop.xlane.xlu1 %1848 }
 0xff7   :  { %v1853_v60 = vmul.f32 0.03125, %v1849_v59 }
 0xff8   :  { %v1856_v61 = vadd.f32 1e-06, %v1854_v58 }
 0xff9   :  { %v1855_v62 = vadd.f32 1e-06, %v1853_v60 }
 0xffa   :  { %4327 = vrsqrt.f32 %v1856_v61 }
 0xffb   :  { %4329 = vrsqrt.f32 %v1855_v62 }
0x1004   :  { %v4328_v63 = vpop.eup %4327 }
0x1005   :  { %v4330_v1 = vpop.eup %4329  ;;  %v1860_v2 = vmul.f32 %v4328_v63, %v1844_v47 }
0x1006   :  { %v1859_v3 = vmul.f32 %v4330_v1, %v1843_v48 }
0x1007   :  { %v1868_v4 = vmul.f32 %v3741_v0, %v1860_v2 }
0x1008   :  { %v1867_v5 = vmul.f32 %v3741_v0, %v1859_v3 }
0x1009   :  { %v4837_v7 = vadd.f32 %v3742_v13, %v1868_v4 }
0x100a   :  { %v4835_v6 = vadd.f32 %v3742_v13, %v1867_v5 }
0x100c   :  { %4067 = vmatprep.mubr.msk.f32.mxu1 %vm77_vm0, %v4835_v6 }
0x100d   :  { %4068 = vmatmul.mubr.msk.f32.vlgmr.msra.gmra.mrb[22].mxu1 %vm77_vm0, %v4837_v7 }
0x100e   :  { %4072 = vmatprep.mubr.msk.f32.mxu1 %vm4448_vm1, %v4447_v11 }
0x10e0   :  { %v4845_v9 = vpop.f32.mrb[22].mxu1 }
0x10e1   :  { %2041 = vrot.lane.b32.xlu0 %v4845_v9, %s4449_s1  ;;  %v4849_v14 = vpop.f32.mrb[23].mxu1 }
0x10e2   :  { %1964 = vrot.lane.b32.xlu1 %v4849_v14, %s4449_s1  ;;  %s5122_s1 = smov 40  }
0x1153   :  { %v2042_v16 = vpop.permute.xlu0 %2041 }
0x1154   :  { %v1965_v15 = vpop.permute.xlu1 %1964 }
0x1155   :  { %4071 = vmatpush3.xpose.msk.msra.mxu1 %vm162_vm2, %v1965_v15 }
0x1156   :  { %4075 = vmatprep.subr.mxu1 %v4447_v11 }
0x1158   :  { %4073 = vmatmul.mubr.msk.f32.vlgmr.msra.gmra.mrb[24].mxu1 %vm162_vm2, %v4849_v14 }
0x1159   :  { %4076 = vmatpush3.xpose.msk.msra.mxu1 %vm162_vm2, %v2042_v16  ;;  %4077 = vmatprep.mubr.msk.f32.mxu1 %vm4448_vm1, %v4447_v11 }
0x115a   :  { %4085 = vmatprep.subr.mxu1 %v4447_v11 }
0x115c   :  { %4078 = vmatmul.mubr.msk.f32.vlgmr.msra.gmra.mrb[26].mxu1 %vm162_vm2, %v4845_v9 }
0x115d   :  { %4087 = vmatprep.mubr.msk.f32.mxu1 %vm4448_vm1, %v4447_v11 }
0x122b   :  { %v2036_v17 = vpop.f32.mrb[24].mxu1 }
0x122c   :  { %v4074_v18 = vpop.f32.mrb[25].mxu1  ;;  %v2117_v12 = vsel %vm162_vm2, %v2036_v17, -inf }
0x122d   :  { %2118 = vmax.xlane.f32.xlu1 %v2117_v12 }
0x122f   :  { %v2113_v19 = vpop.f32.mrb[26].mxu1 }
0x1230   :  { %v4079_v20 = vpop.f32.mrb[27].mxu1  ;;  %v2120_v21 = vsel %vm162_vm2, %v2113_v19, -inf }
0x1231   :  { %2121 = vmax.xlane.f32.xlu0 %v2120_v21 }
0x123e   :  { %2139 = vrot.lane.b32.xlu1 %v4849_v14, %s4450_s18 }
0x1242   :  { %2293 = vrot.lane.b32.xlu1 %v4849_v14, %s4451_s21 }
0x1246   :  { %2371 = vrot.lane.b32.xlu1 %v4845_v9, %s4451_s21  ;;  %s5124_s21 = smov 16  }
0x1247   :  { %2215 = vrot.lane.b32.xlu0 %v4845_v9, %s4450_s18  ;;  %s5123_s18 = smov 8  }
0x12ba   :  { %v2119_v22 = vpop.xlane.xlu1 %2118 }
0x12bb   :  { %v2123_v23 = vsub.f32 %v2036_v17, %v2119_v22 }
0x12bd   :  { %v2125_v24 = vmul.f32 1.442695, %v2123_v23 }
0x12be   :  { %v2140_v25 = vpop.permute.xlu1 %2139  ;;  %v2122_v26 = vpop.xlane.xlu0 %2121 }
0x12bf   :  { %4331 = vpow2.f32 %v2125_v24  ;;  %v2124_v27 = vsub.f32 %v2113_v19, %v2122_v26  ;;  %4081 = vmatpush3.msra.mxu0 %v2140_v25 }
0x12c0   :  { %4090 = vmatprep.subr.mxu0 %v4447_v11 }
0x12c1   :  { %v2127_v28 = vmul.f32 1.442695, %v2124_v27 }
0x12c2   :  { %v2216_v29 = vpop.permute.xlu0 %2215  ;;  %v2294_v34 = vpop.permute.xlu1 %2293 }
0x12c3   :  { %4333 = vpow2.f32 %v2127_v28  ;;  %4086 = vmatpush3.msra.mxu1 %v2216_v29 }
0x12c4   :  { %4095 = vmatprep.subr.mxu1 %v4447_v11 }
0x12c6   :  { %v2372_v35 = vpop.permute.xlu1 %2371 }
0x12c9   :  { %v4332_v30 = vpop.eup %4331 }
0x12ca   :  { %v2129_v31 = vsel %vm162_vm2, %v4332_v30, 0.0 }
0x12cb   :  { %2130 = vadd.xlane.f32.xlu1 %v2129_v31 }
0x12cd   :  { %v4334_v32 = vpop.eup %4333 }
0x12ce   :  { %v2132_v33 = vsel %vm162_vm2, %v4334_v32, 0.0 }
0x12cf   :  { %2133 = vadd.xlane.f32.xlu0 %v2132_v33 }
0x12dc   :  { %2369 = vrot.lane.b32.xlu1 %v4845_v9, %s4452_s23 }
0x12e5   :  { %2291 = vrot.lane.b32.xlu0 %v4849_v14, %s4452_s23 }
0x1358   :  { %v2131_v36 = vpop.xlane.xlu1 %2130 }
0x1359   :  { %4335 = vrcp.f32 %v2131_v36 }
0x135c   :  { %v2134_v37 = vpop.xlane.xlu0 %2133  ;;  %v2370_v42 = vpop.permute.xlu1 %2369 }
0x135d   :  { %4337 = vrcp.f32 %v2134_v37 }
0x1360   :  { %v2292_v41 = vpop.permute.xlu0 %2291 }
0x1363   :  { %v4336_v38 = vpop.eup %4335 }
0x1364   :  { %v2136_v39 = vmul.f32 %v4336_v38, %v4332_v30 }
0x1366   :  { %4083 = vmatmul.mubr.msk.f32.vlgmr.msra.gmra.mrb[18].mxu0 %vm162_vm2, %v2136_v39 }
0x1367   :  { %v4338_v44 = vpop.eup %4337  ;;  %4091 = vmatpush3.xpose.msk.msra.mxu0 %vm162_vm2, %v2294_v34  ;;  %4092 = vmatprep.mubr.msk.f32.mxu0 %vm4448_vm1, %v4447_v11 }
0x1368   :  { %v2138_v40 = vmul.f32 %v4338_v44, %v4334_v32  ;;  %4100 = vmatprep.subr.mxu0 %v4447_v11 }
0x136a   :  { %4088 = vmatmul.mubr.msk.f32.vlgmr.msra.gmra.mrb[28].mxu1 %vm162_vm2, %v2138_v40  ;;  %4093 = vmatmul.mubr.msk.f32.vlgmr.msra.gmra.mrb[20].mxu0 %vm162_vm2, %v2292_v41 }
0x136b   :  { %4096 = vmatpush3.xpose.msk.msra.mxu1 %vm162_vm2, %v2372_v35  ;;  %4097 = vmatprep.mubr.msk.f32.mxu1 %vm4448_vm1, %v4447_v11 }
0x136c   :  { %4105 = vmatprep.subr.mxu1 %v4447_v11  ;;  %4102 = vmatprep.mubr.msk.f32.mxu0 %vm4448_vm1, %v4447_v11 }
0x136e   :  { %4098 = vmatmul.mubr.msk.f32.vlgmr.msra.gmra.mrb[30].mxu1 %vm162_vm2, %v2370_v42 }
0x136f   :  { %4107 = vmatprep.mubr.msk.f32.mxu1 %vm4448_vm1, %v4447_v11 }
0x1439   :  { %v4899_v43 = vpop.f32.mrb[18].mxu0 }
0x143a   :  { %v4084_v45 = vpop.f32.mrb[19].mxu0 }
0x143d   :  { %v4901_v46 = vpop.f32.mrb[28].mxu1  ;;  %v2365_v47 = vpop.f32.mrb[20].mxu0 }
0x143e   :  { %v4089_v48 = vpop.f32.mrb[29].mxu1  ;;  %v4094_v49 = vpop.f32.mrb[21].mxu0  ;;  %v2447_v50 = vsel %vm162_vm2, %v2365_v47, -inf }
0x143f   :  { %2448 = vmax.xlane.f32.xlu0 %v2447_v50 }
0x1441   :  { %v2443_v51 = vpop.f32.mrb[30].mxu1 }
0x1442   :  { %v4099_v52 = vpop.f32.mrb[31].mxu1  ;;  %v2450_v53 = vsel %vm162_vm2, %v2443_v51, -inf }
0x1443   :  { %2451 = vmax.xlane.f32.xlu1 %v2450_v53 }
0x1454   :  { %2469 = vrot.lane.b32.xlu1 %v4849_v14, %s4453_s24 }
0x1455   :  { %2545 = vrot.lane.b32.xlu0 %v4845_v9, %s4453_s24 }
0x1458   :  { %2623 = vrot.lane.b32.xlu1 %v4849_v14, %s4454_s25 }
0x145c   :  { %2701 = vrot.lane.b32.xlu1 %v4845_v9, %s4454_s25 }
0x1460   :  { %2699 = vrot.lane.b32.xlu1 %v4845_v9, %s4455_s26 }
0x14cc   :  { %v2449_v54 = vpop.xlane.xlu0 %2448 }
0x14cd   :  { %v2453_v10 = vsub.f32 %v2365_v47, %v2449_v54 }
0x14cf   :  { %v2455_v8 = vmul.f32 1.442695, %v2453_v10 }
0x14d0   :  { %v2546_v55 = vpop.permute.xlu0 %2545  ;;  %v2452_v56 = vpop.xlane.xlu1 %2451 }
0x14d1   :  { %4339 = vpow2.f32 %v2455_v8  ;;  %v2454_v57 = vsub.f32 %v2443_v51, %v2452_v56  ;;  %4106 = vmatpush3.msra.mxu1 %v2546_v55 }
0x14d2   :  { %4115 = vmatprep.subr.mxu1 %v4447_v11 }
0x14d3   :  { %v2457_v58 = vmul.f32 1.442695, %v2454_v57 }
0x14d4   :  { %v2470_v59 = vpop.permute.xlu1 %2469 }
0x14d5   :  { %4341 = vpow2.f32 %v2457_v58  ;;  %4101 = vmatpush3.msra.mxu0 %v2470_v59 }
0x14d6   :  { %4110 = vmatprep.subr.mxu0 %v4447_v11 }
0x14d8   :  { %v2624_v2 = vpop.permute.xlu1 %2623 }
0x14db   :  { %v4340_v60 = vpop.eup %4339 }
0x14dc   :  { %v2459_v61 = vsel %vm162_vm2, %v4340_v60, 0.0  ;;  %v2702_v5 = vpop.permute.xlu1 %2701 }
0x14dd   :  { %2460 = vadd.xlane.f32.xlu0 %v2459_v61 }
0x14df   :  { %v4342_v62 = vpop.eup %4341 }
0x14e0   :  { %v2462_v63 = vsel %vm162_vm2, %v4342_v62, 0.0  ;;  %v2700_v17 = vpop.permute.xlu1 %2699 }
0x14e1   :  { %2463 = vadd.xlane.f32.xlu0 %v2462_v63 }
0x14f7   :  { %2621 = vrot.lane.b32.xlu0 %v4849_v14, %s4455_s26 }
0x156a   :  { %v2461_v0 = vpop.xlane.xlu0 %2460 }
0x156b   :  { %4343 = vrcp.f32 %v2461_v0 }
0x156e   :  { %v2464_v1 = vpop.xlane.xlu0 %2463 }
0x156f   :  { %4345 = vrcp.f32 %v2464_v1 }
0x1572   :  { %v2622_v16 = vpop.permute.xlu0 %2621 }
0x1575   :  { %v4344_v3 = vpop.eup %4343 }
0x1576   :  { %v2466_v13 = vmul.f32 %v4344_v3, %v4340_v60 }
0x1578   :  { %4103 = vmatmul.mubr.msk.f32.vlgmr.msra.gmra.mrb[22].mxu0 %vm162_vm2, %v2466_v13 }
0x1579   :  { %v4346_v4 = vpop.eup %4345  ;;  %4111 = vmatpush3.xpose.msk.msra.mxu0 %vm162_vm2, %v2624_v2  ;;  %4112 = vmatprep.mubr.msk.f32.mxu0 %vm4448_vm1, %v4447_v11 }
0x157a   :  { %v2468_v15 = vmul.f32 %v4346_v4, %v4342_v62  ;;  %4120 = vmatprep.subr.mxu0 %v4447_v11 }
0x157c   :  { %4108 = vmatmul.mubr.msk.f32.vlgmr.msra.gmra.mrb[32].mxu1 %vm162_vm2, %v2468_v15  ;;  %4113 = vmatmul.mubr.msk.f32.vlgmr.msra.gmra.mrb[24].mxu0 %vm162_vm2, %v2622_v16 }
0x157d   :  { %4116 = vmatpush3.xpose.msk.msra.mxu1 %vm162_vm2, %v2702_v5  ;;  %4117 = vmatprep.mubr.msk.f32.mxu1 %vm4448_vm1, %v4447_v11 }
0x157e   :  { %4125 = vmatprep.subr.mxu1 %v4447_v11  ;;  %4122 = vmatprep.mubr.msk.f32.mxu0 %vm4448_vm1, %v4447_v11 }
0x1580   :  { %4118 = vmatmul.mubr.msk.f32.vlgmr.msra.gmra.mrb[34].mxu1 %vm162_vm2, %v2700_v17 }
0x1581   :  { %4127 = vmatprep.mubr.msk.f32.mxu1 %vm4448_vm1, %v4447_v11 }
0x164b   :  { %v4937_v18 = vpop.f32.mrb[22].mxu0 }
0x164c   :  { %v4104_v12 = vpop.f32.mrb[23].mxu0 }
0x164d   :  { %v3774_v12 = vld [vmem:[%s5103_s3 + $0x28] sm:$0xff] }
0x164f   :  { %v4939_v19 = vpop.f32.mrb[32].mxu1  ;;  %v2695_v20 = vpop.f32.mrb[24].mxu0 }
0x1650   :  { %v4109_v21 = vpop.f32.mrb[33].mxu1  ;;  %v4114_v22 = vpop.f32.mrb[25].mxu0  ;;  %v2777_v23 = vsel %vm162_vm2, %v2695_v20, -inf }
0x1651   :  { %2778 = vmax.xlane.f32.xlu0 %v2777_v23  ;;  %v3776_v21 = vld [vmem:[%s5103_s3 + $0x38] sm:$0xff] }
0x1653   :  { %v2773_v24 = vpop.f32.mrb[34].mxu1 }
0x1654   :  { %v4119_v25 = vpop.f32.mrb[35].mxu1  ;;  %v2780_v26 = vsel %vm162_vm2, %v2773_v24, -inf }
0x1655   :  { %2781 = vmax.xlane.f32.xlu1 %v2780_v26 }
0x1666   :  { %2799 = vrot.lane.b32.xlu1 %v4849_v14, %s4456_s27 }
0x1667   :  { %2875 = vrot.lane.b32.xlu0 %v4845_v9, %s4456_s27 }
0x166a   :  { %2953 = vrot.lane.b32.xlu1 %v4849_v14, %s4457_s0 }
0x166e   :  { %3031 = vrot.lane.b32.xlu1 %v4845_v9, %s4457_s0 }
0x1672   :  { %3029 = vrot.lane.b32.xlu1 %v4845_v9, %s4458_s22 }
0x16de   :  { %v2779_v27 = vpop.xlane.xlu0 %2778 }
0x16df   :  { %v2783_v28 = vsub.f32 %v2695_v20, %v2779_v27  ;;  %v3775_v20 = vld [vmem:[%s5103_s3 + $0x30] sm:$0xff] }
0x16e0   :  { %v4243_v22 = vpack.c.bf16 %v3776_v21, %v3775_v20 }
0x16e1   :  { %v2785_v29 = vmul.f32 1.442695, %v2783_v28 }
0x16e2   :  { %v2876_v30 = vpop.permute.xlu0 %2875  ;;  %v2782_v31 = vpop.xlane.xlu1 %2781 }
0x16e3   :  { %4347 = vpow2.f32 %v2785_v29  ;;  %v2784_v32 = vsub.f32 %v2773_v24, %v2782_v31  ;;  %4126 = vmatpush3.msra.mxu1 %v2876_v30 }
0x16e4   :  { %4135 = vmatprep.subr.mxu1 %v4447_v11 }
0x16e5   :  { %v2787_v33 = vmul.f32 1.442695, %v2784_v32 }
0x16e6   :  { %v2800_v34 = vpop.permute.xlu1 %2799 }
0x16e7   :  { %4349 = vpow2.f32 %v2787_v33  ;;  %4121 = vmatpush3.msra.mxu0 %v2800_v34 }
0x16e8   :  { %4130 = vmatprep.subr.mxu0 %v4447_v11 }
0x16ea   :  { %v2954_v40 = vpop.permute.xlu1 %2953 }
0x16ed   :  { %v4348_v35 = vpop.eup %4347 }
0x16ee   :  { %v2789_v36 = vsel %vm162_vm2, %v4348_v35, 0.0  ;;  %v3032_v47 = vpop.permute.xlu1 %3031 }
0x16ef   :  { %2790 = vadd.xlane.f32.xlu0 %v2789_v36 }
0x16f1   :  { %v4350_v37 = vpop.eup %4349 }
0x16f2   :  { %v2792_v38 = vsel %vm162_vm2, %v4350_v37, 0.0  ;;  %v3030_v50 = vpop.permute.xlu1 %3029 }
0x16f3   :  { %2793 = vadd.xlane.f32.xlu0 %v2792_v38 }
0x1709   :  { %2951 = vrot.lane.b32.xlu0 %v4849_v14, %s4458_s22 }
0x177c   :  { %v2791_v39 = vpop.xlane.xlu0 %2790 }
0x177d   :  { %4351 = vrcp.f32 %v2791_v39 }
0x1780   :  { %v2794_v44 = vpop.xlane.xlu0 %2793 }
0x1781   :  { %4353 = vrcp.f32 %v2794_v44 }
0x1784   :  { %v2952_v49 = vpop.permute.xlu0 %2951 }
0x1787   :  { %v4352_v41 = vpop.eup %4351 }
0x1788   :  { %v2796_v42 = vmul.f32 %v4352_v41, %v4348_v35 }
0x178a   :  { %4123 = vmatmul.mubr.msk.f32.vlgmr.msra.gmra.mrb[26].mxu0 %vm162_vm2, %v2796_v42 }
0x178b   :  { %v4354_v45 = vpop.eup %4353  ;;  %4131 = vmatpush3.xpose.msk.msra.mxu0 %vm162_vm2, %v2954_v40  ;;  %4132 = vmatprep.mubr.msk.f32.mxu0 %vm4448_vm1, %v4447_v11 }
0x178c   :  { %v2798_v48 = vmul.f32 %v4354_v45, %v4350_v37  ;;  %4140 = vmatprep.subr.mxu0 %v4447_v11 }
0x178e   :  { %4128 = vmatmul.mubr.msk.f32.vlgmr.msra.gmra.mrb[36].mxu1 %vm162_vm2, %v2798_v48  ;;  %4133 = vmatmul.mubr.msk.f32.vlgmr.msra.gmra.mrb[28].mxu0 %vm162_vm2, %v2952_v49 }
0x178f   :  { %4136 = vmatpush3.xpose.msk.msra.mxu1 %vm162_vm2, %v3032_v47  ;;  %4137 = vmatprep.mubr.msk.f32.mxu1 %vm4448_vm1, %v4447_v11 }
0x1790   :  { %4145 = vmatprep.subr.mxu1 %v4447_v11  ;;  %4142 = vmatprep.mubr.msk.f32.mxu0 %vm4448_vm1, %v4447_v11 }
0x1792   :  { %4138 = vmatmul.mubr.msk.f32.vlgmr.msra.gmra.mrb[38].mxu1 %vm162_vm2, %v3030_v50 }
0x1793   :  { %4147 = vmatprep.mubr.msk.f32.mxu1 %vm4448_vm1, %v4447_v11 }
0x185d   :  { %v2871_v51 = vpop.f32.mrb[26].mxu0 }
0x185e   :  { %v4124_v52 = vpop.f32.mrb[27].mxu0 }
0x1861   :  { %v2947_v53 = vpop.f32.mrb[36].mxu1  ;;  %v3025_v54 = vpop.f32.mrb[28].mxu0 }
0x1862   :  { %v4129_v10 = vpop.f32.mrb[37].mxu1  ;;  %v4134_v8 = vpop.f32.mrb[29].mxu0  ;;  %v3107_v55 = vsel %vm162_vm2, %v3025_v54, -inf }
0x1863   :  { %3108 = vmax.xlane.f32.xlu0 %v3107_v55  ;;  %v3785_v8 = vld [vmem:[%s5106_s6 + $0x30] sm:$0xff]  ;;  %v3786_v55 = vld [vmem:[%s5106_s6 + $0x38] sm:$0xff] }
0x1865   :  { %v3103_v56 = vpop.f32.mrb[38].mxu1 }
0x1866   :  { %v4139_v57 = vpop.f32.mrb[39].mxu1  ;;  %v3110_v58 = vsel %vm162_vm2, %v3103_v56, -inf }
0x1867   :  { %3111 = vmax.xlane.f32.xlu1 %v3110_v58  ;;  %v3791_v57 = vld [vmem:[%s5108_s8 + $0x40] sm:$0xff]  ;;  %v3792_v58 = vld [vmem:[%s5108_s8 + $0x48] sm:$0xff] }
0x1878   :  { %3129 = vrot.lane.b32.xlu1 %v4849_v14, %s5122_s1 }
0x187c   :  { %3283 = vrot.lane.b32.xlu1 %v4937_v18, %s5123_s18 }
0x1880   :  { %3285 = vrot.lane.b32.xlu1 %v4939_v19, %s5123_s18 }
0x1884   :  { %3293 = vrot.lane.b32.xlu1 %v2947_v53, %s5124_s21 }
0x18f0   :  { %v3109_v11 = vpop.xlane.xlu0 %3108 }
0x18f1   :  { %v3113_v59 = vsub.f32 %v3025_v54, %v3109_v11  ;;  %v3784_v54 = vld [vmem:[%s5106_s6 + $0x28] sm:$0xff]  ;;  %v3793_v11 = vld [vmem:[%s5108_s8 + $0x50] sm:$0xff] }
0x18f3   :  { %v3115_v60 = vmul.f32 1.442695, %v3113_v59  ;;  %v4255_v59 = vpack.c.bf16 %v3792_v58, %v3791_v57  ;;  %v3806_v58 = vld [vmem:[%s5111_s11 + $0x1] ss:$0 sm:$0xff] }
0x18f4   :  { %v3112_v61 = vpop.xlane.xlu1 %3111 }
0x18f5   :  { %4355 = vpow2.f32 %v3115_v60  ;;  %v3114_v62 = vsub.f32 %v3103_v56, %v3112_v61  ;;  %v4251_v56 = vpack.c.bf16 %v3786_v55, %v3785_v8  ;;  %v3794_v60 = vld [vmem:[%s5108_s8 + $0x58] sm:$0xff]  ;;  %v3805_v8 = vld [vmem:[%s5110_s10 + $0x1] ss:$0 sm:$0xff] }
0x18f6   :  { %v4259_v61 = vpack.c.bf16 %v3794_v60, %v3793_v11 }
0x18f7   :  { %v3117_v63 = vmul.f32 1.442695, %v3114_v62  ;;  %v3795_v62 = vld [vmem:[%s5108_s8 + $0x60] sm:$0xff] }
0x18f8   :  { %v3130_v0 = vpop.permute.xlu1 %3129 }
0x18f9   :  { %4357 = vpow2.f32 %v3117_v63  ;;  %4141 = vmatpush3.msra.mxu0 %v3130_v0  ;;  %v3796_v63 = vld [vmem:[%s5108_s8 + $0x68] sm:$0xff] }
0x18fa   :  { %v4263_v0 = vpack.c.bf16 %v3796_v63, %v3795_v62 }
0x18fc   :  { %v3284_v27 = vpop.permute.xlu1 %3283 }
0x18fd   :  { %v3305_v30 = vsel %vm162_vm2, %v4899_v43, %v3284_v27 }
0x18ff   :  { %v4356_v1 = vpop.eup %4355 }
0x1900   :  { %v3119_v14 = vsel %vm162_vm2, %v4356_v1, 0.0  ;;  %v3286_v28 = vpop.permute.xlu1 %3285 }
0x1901   :  { %3120 = vadd.xlane.f32.xlu0 %v3119_v14  ;;  %v3306_v35 = vsel %vm162_vm2, %v4901_v46, %v3286_v28 }
0x1903   :  { %v4358_v2 = vpop.eup %4357 }
0x1904   :  { %v3122_v3 = vsel %vm162_vm2, %v4358_v2, 0.0  ;;  %v3294_v31 = vpop.permute.xlu1 %3293 }
0x1905   :  { %3123 = vadd.xlane.f32.xlu0 %v3122_v3  ;;  %v3308_v36 = vsel %vm1504_vm4, %v3306_v35, %v3294_v31 }
0x191b   :  { %3205 = vrot.lane.b32.xlu0 %v4845_v9, %s5122_s1  ;;  %v3773_v9 = vld [vmem:[%s5103_s3 + $0x20] sm:$0xff]  ;;  %s3692_s1 = sshll.u32 %s4462_s15, 4  ;;  %s3693_s1 = int_to_ptr.vmem [resolvable:$true] %s3692_s1 }
0x191c   :  { %v4239_v19 = vpack.c.bf16 %v3774_v12, %v3773_v9  ;;  %p4420_p3 = scmp.lt.s32.totalorder %s3693_s1, %s3693_s1 }
0x191e   :  { %4240 = vmatprep.subr.bf16.mxu0 %v4239_v19 }
0x191f   :  { %3291 = vrot.lane.b32.xlu0 %v2871_v51, %s5124_s21  ;;  %s4415_s21 = scalar_lea.vmem %s3693_s1, 256 }
0x1920   :  { %p4416_p2 = scmp.ne.s32.totalorder %s3693_s1, %s4415_s21  ;;  %p4421_p4 = scmp.lt.s32.totalorder %s4415_s21, %s4415_s21 }
0x1922   :  { %p4422_p5 = por %p4421_p4, %p4420_p3 }
0x1924   :  { %p4423_p6 = pnand %p4422_p5, %p4416_p2 }
0x198e   :  { %v3121_v13 = vpop.xlane.xlu0 %3120 }
0x198f   :  { %4359 = vrcp.f32 %v3121_v13 }
0x1992   :  { %v3124_v4 = vpop.xlane.xlu0 %3123 }
0x1993   :  { %4361 = vrcp.f32 %v3124_v4 }
0x1996   :  { %v3206_v5 = vpop.permute.xlu0 %3205 }
0x1997   :  { %4146 = vmatpush3.msra.mxu1 %v3206_v5 }
0x1999   :  { %v4360_v15 = vpop.eup %4359 }
0x199a   :  { %v3126_v16 = vmul.f32 %v4360_v15, %v4356_v1  ;;  %v3292_v29 = vpop.permute.xlu0 %3291  ;;  %v3781_v15 = vld [vmem:[%s5104_s4 + $0x1] ss:$0 sm:$0xff] }
0x199b   :  { %v3307_v32 = vsel %vm1504_vm4, %v3305_v30, %v3292_v29 }
0x199c   :  { %4143 = vmatmul.mubr.msk.f32.vlgmr.msra.gmra.mrb[30].mxu0 %vm162_vm2, %v3126_v16 }
0x199d   :  { %v4362_v17 = vpop.eup %4361  ;;  %4242 = vmatpush3.bf16.msra.mxu0 %v4239_v19 }
0x199e   :  { %v3128_v18 = vmul.f32 %v4362_v17, %v4358_v2  ;;  %4244 = vmatprep.subr.bf16.mxu0 %v4243_v22  ;;  %v3782_v17 = vld [vmem:[%s5105_s5 + $0x1] ss:$0 sm:$0xff] }
0x19a0   :  { %4148 = vmatmul.mubr.msk.f32.vlgmr.msra.gmra.mrb[40].mxu1 %vm162_vm2, %v3128_v18 }
0x19a1   :  { %4246 = vmatpush3.bf16.msra.mxu0 %v4243_v22  ;;  %v3797_v22 = vld [vmem:[%s5108_s8 + $0x70] sm:$0xff] }
0x19a2   :  { %4256 = vmatprep.subr.bf16.mxu0 %v4255_v59 }
0x1a6f   :  { %v3201_v23 = vpop.f32.mrb[30].mxu0 }
0x1a70   :  { %3299 = vrot.lane.b32.xlu0 %v3201_v23, %s5125_s17  ;;  %v4144_v24 = vpop.f32.mrb[31].mxu0  ;;  %v3798_v23 = vld [vmem:[%s5108_s8 + $0x78] sm:$0xff] }
0x1a71   :  { %v4267_v24 = vpack.c.bf16 %v3798_v23, %v3797_v22 }
0x1a73   :  { %v3277_v25 = vpop.f32.mrb[40].mxu1 }
0x1a74   :  { %3301 = vrot.lane.b32.xlu1 %v3277_v25, %s5125_s17  ;;  %v4149_v26 = vpop.f32.mrb[41].mxu1  ;;  %v3788_v25 = vld [vmem:[%s5107_s7 + $0x1] ss:$0 sm:$0xff] }
0x1ae2   :  { %v3300_v33 = vpop.permute.xlu0 %3299 }
0x1ae3   :  { %v3309_v34 = vsel %vm1507_vm3, %v3307_v32, %v3300_v33  ;;  %v3800_v32 = vld [vmem:[%s5109_s9 + $0x1] ss:$0 sm:$0xff] }
0x1ae4   :  { %4158 = vmatprep.mubr.msk.f32.mxu0 %vm77_vm0, %v3309_v34 }
0x1ae6   :  { %v3302_v37 = vpop.permute.xlu1 %3301 }
0x1ae7   :  { %v3310_v38 = vsel %vm1507_vm3, %v3308_v36, %v3302_v37 }
0x1ae8   :  { %4159 = vmatmul.mubr.msk.f32.vlgmr.msra.gmra.mrb[32].mxu0 %vm77_vm0, %v3310_v38 }
0x1ae9   :  { %4258 = vmatpush3.bf16.msra.mxu0 %v4255_v59 }
0x1aea   :  { %4260 = vmatprep.subr.bf16.mxu0 %v4259_v61 }
0x1aed   :  { %4262 = vmatpush3.bf16.msra.mxu0 %v4259_v61 }
0x1aee   :  { %4264 = vmatprep.subr.bf16.mxu0 %v4263_v0 }
0x1af1   :  { %4266 = vmatpush3.bf16.msra.mxu0 %v4263_v0 }
0x1af2   :  { %4268 = vmatprep.subr.bf16.mxu0 %v4267_v24 }
0x1af5   :  { %4270 = vmatpush3.bf16.msra.mxu0 %v4267_v24 }
0x1bbb   :  { %v4160_v39 = vpop.f32.mrb[32].mxu0 }
0x1bbc   :  { %v3394_v43 = vadd.f32 %v4160_v39, %v4837_v7  ;;  %v3388_v44 = vpop.f32.mrb[33].mxu0 }
0x1bbd   :  { %v3389_v40 = vadd.f32 %v3388_v44, %v4835_v6  ;;  %v3783_v6 = vld [vmem:[%s5106_s6 + $0x20] sm:$0xff] }
0x1bbe   :  { %v3404_v41 = vsel %vm77_vm0, %v3394_v43, 0.0  ;;  %v4247_v10 = vpack.c.bf16 %v3784_v54, %v3783_v6 }
0x1bbf   :  { %3405 = vadd.xlane.f32.xlu1 %v3404_v41  ;;  %v3401_v42 = vsel %vm77_vm0, %v3389_v40, 0.0 }
0x1bc0   :  { %3402 = vadd.xlane.f32.xlu0 %v3401_v42  ;;  %4248 = vmatprep.subr.bf16.mxu1 %v4247_v10 }
0x1bc1   :  { %4250 = vmatpush3.bf16.msra.mxu1 %v4247_v10 }
0x1bc2   :  { %4252 = vmatprep.subr.bf16.mxu1 %v4251_v56 }
0x1bc5   :  { %4254 = vmatpush3.bf16.msra.mxu1 %v4251_v56 }
0x1c4c   :  { %v3406_v46 = vpop.xlane.xlu1 %3405 }
0x1c4d   :  { %v3408_v45 = vmul.f32 0.03125, %v3406_v46  ;;  %v3403_v47 = vpop.xlane.xlu0 %3402 }
0x1c4e   :  { %v3407_v48 = vmul.f32 0.03125, %v3403_v47 }
0x1c4f   :  { %v3410_v49 = vsub.f32 %v3394_v43, %v3408_v45 }
0x1c50   :  { %v3409_v50 = vsub.f32 %v3389_v40, %v3407_v48 }
0x1c51   :  { %v3412_v53 = vmul.f32 %v3410_v49, %v3410_v49 }
0x1c52   :  { %v3411_v51 = vmul.f32 %v3409_v50, %v3409_v50 }
0x1c53   :  { %v3416_v7 = vsel %vm77_vm0, %v3412_v53, 0.0 }
0x1c54   :  { %v3413_v52 = vsel %vm77_vm0, %v3411_v51, 0.0 }
0x1c55   :  { %3414 = vadd.xlane.f32.xlu0 %v3413_v52 }
0x1c59   :  { %3417 = vadd.xlane.f32.xlu0 %v3416_v7 }
0x1ce2   :  { %v3415_v1 = vpop.xlane.xlu0 %3414 }
0x1ce3   :  { %v3419_v14 = vmul.f32 0.03125, %v3415_v1 }
0x1ce5   :  { %v3421_v2 = vadd.f32 1e-06, %v3419_v14 }
0x1ce6   :  { %v3418_v3 = vpop.xlane.xlu0 %3417 }
0x1ce7   :  { %4363 = vrsqrt.f32 %v3421_v2  ;;  %v3420_v13 = vmul.f32 0.03125, %v3418_v3 }
0x1ce9   :  { %v3422_v4 = vadd.f32 1e-06, %v3420_v13 }
0x1ceb   :  { %4365 = vrsqrt.f32 %v3422_v4 }
0x1cf1   :  { %v4364_v5 = vpop.eup %4363 }
0x1cf2   :  { %v3425_v16 = vmul.f32 %v4364_v5, %v3409_v50 }
0x1cf4   :  { %v3433_v18 = vmul.f32 %v3781_v15, %v3425_v16 }
0x1cf5   :  { %v4366_v9 = vpop.eup %4365 }
0x1cf6   :  { %v3426_v12 = vmul.f32 %v4366_v9, %v3410_v49  ;;  %v3441_v19 = vadd.f32 %v3782_v17, %v3433_v18 }
0x1cf8   :  { %v3434_v20 = vmul.f32 %v3781_v15, %v3426_v12  ;;  %4169 = vmatprep.mubr.msk.f32.mxu1 %vm77_vm0, %v3441_v19 }
0x1cfa   :  { %v3442_v21 = vadd.f32 %v3782_v17, %v3434_v20 }
0x1cfc   :  { %4170 = vmatmul.mubr.msk.f32.vlgmr.msra.gmra.mrb[42].mxu1 %vm77_vm0, %v3442_v21 }
0x1dcf   :  { %v4171_v26 = vpop.f32.mrb[42].mxu1 }
0x1dd0   :  { %v3534_v27 = vadd.f32 %v4171_v26, %v3788_v25  ;;  %v3528_v28 = vpop.f32.mrb[43].mxu1 }
0x1dd1   :  { %v3529_v29 = vadd.f32 %v3788_v25, %v3528_v28 }
0x1dd2   :  { %v3538_v31 = vmax.f32 %v3534_v27, 0.0 }
0x1dd3   :  { %v3537_v30 = vmax.f32 %v3529_v29, 0.0 }
0x1dd5   :  { %4188 = vmatprep.mubr.msk.f32.mxu0 %vm1749_vm5, %v3537_v30 }
0x1dd6   :  { %4189 = vmatmul.mubr.msk.f32.vlgmr.msra.gmra.mrb[34].mxu0 %vm1749_vm5, %v3538_v31 }
0x1ea9   :  { %v4190_v33 = vpop.f32.mrb[34].mxu0 }
0x1eaa   :  { %v3634_v34 = vadd.f32 %v4190_v33, %v3800_v32  ;;  %v3628_v35 = vpop.f32.mrb[35].mxu0 }
0x1eab   :  { %v3629_v36 = vadd.f32 %v3800_v32, %v3628_v35 }
0x1eac   :  { %v3638_v37 = vadd.f32 %v3634_v34, %v3442_v21 }
0x1ead   :  { %v3637_v38 = vadd.f32 %v3629_v36, %v3441_v19 }
0x1eae   :  { %v3646_v39 = vsel %vm77_vm0, %v3638_v37, 0.0 }
0x1eaf   :  { %3647 = vadd.xlane.f32.xlu0 %v3646_v39  ;;  %v3643_v43 = vsel %vm77_vm0, %v3637_v38, 0.0 }
0x1eb0   :  { %3644 = vadd.xlane.f32.xlu1 %v3643_v43 }
0x1f3c   :  { %v3648_v44 = vpop.xlane.xlu0 %3647 }
0x1f3d   :  { %v3650_v40 = vmul.f32 0.03125, %v3648_v44  ;;  %v3645_v41 = vpop.xlane.xlu1 %3644 }
0x1f3e   :  { %v3649_v42 = vmul.f32 0.03125, %v3645_v41 }
0x1f3f   :  { %v3652_v46 = vsub.f32 %v3638_v37, %v3650_v40 }
0x1f40   :  { %v3651_v45 = vsub.f32 %v3637_v38, %v3649_v42 }
0x1f41   :  { %v3654_v47 = vmul.f32 %v3652_v46, %v3652_v46 }
0x1f42   :  { %v3653_v48 = vmul.f32 %v3651_v45, %v3651_v45 }
0x1f43   :  { %v3658_v49 = vsel %vm77_vm0, %v3654_v47, 0.0 }
0x1f44   :  { %3659 = vadd.xlane.f32.xlu0 %v3658_v49  ;;  %v3655_v50 = vsel %vm77_vm0, %v3653_v48, 0.0 }
0x1f45   :  { %3656 = vadd.xlane.f32.xlu1 %v3655_v50 }
0x1fd1   :  { %v3660_v51 = vpop.xlane.xlu0 %3659 }
0x1fd2   :  { %v3662_v52 = vmul.f32 0.03125, %v3660_v51  ;;  %v3657_v53 = vpop.xlane.xlu1 %3656 }
0x1fd3   :  { %v3661_v7 = vmul.f32 0.03125, %v3657_v53 }
0x1fd4   :  { %v3664_v6 = vadd.f32 1e-06, %v3662_v52 }
0x1fd5   :  { %v3663_v54 = vadd.f32 1e-06, %v3661_v7 }
0x1fd6   :  { %4367 = vrsqrt.f32 %v3664_v6 }
0x1fd7   :  { %4369 = vrsqrt.f32 %v3663_v54 }
0x1fe0   :  { %v4368_v10 = vpop.eup %4367 }
0x1fe1   :  { %v4370_v55 = vpop.eup %4369  ;;  %v3668_v56 = vmul.f32 %v4368_v10, %v3652_v46 }
0x1fe2   :  { %v3667_v57 = vmul.f32 %v4370_v55, %v3651_v45 }
0x1fe3   :  { %v3676_v11 = vmul.f32 %v3805_v8, %v3668_v56 }
0x1fe4   :  { %v3675_v59 = vmul.f32 %v3805_v8, %v3667_v57 }
0x1fe5   :  { %v3684_v60 = vadd.f32 %v3806_v58, %v3676_v11 }
0x1fe6   :  { %v3683_v61 = vadd.f32 %v3806_v58, %v3675_v59 }
0x1fe7   :  { %3686 = vst.msk [vmem:[#allocation7 + $0x8] sm:$0xff] %vm77_vm0, %v3684_v60 }
0x1fe8   :  { %3685 = vst.msk [vmem:[#allocation7] sm:$0xff] %vm77_vm0, %v3683_v61 }
0x1fe9   :  { %4426 = shalt.err (!%p4423_p6)
}
0x1fea   :  { %s4427_s23 = scalar_lea.hbm %s5112_s12, 256 }
0x1feb   :  { %p4428_p7 = scmp.ne.s32.totalorder %s5112_s12, %s4427_s23  ;;  %p4431_p8 = scmp.lt.u32.totalorder %s4427_s23, %s5112_s12 }
0x1fed   :  { %p4433_p9 = pnand %p4431_p8, %p4428_p7 }
0x1fef   :  { %4436 = shalt.err (!%p4433_p9)
}
0x1ff0   :  { %s5126_s27 = smov 128  }
0x1ff1   :  { %3698 = dma.vmem_to_hbm [thread:$0]  %s3693_s1, 256, %s5112_s12, [#allocation4], %s5126_s27, %s5126_s27, %s5123_s18  }
0x1ff2   :  { %4441 = dma.done.wait [#allocation4], 256  }
0x1ff3   :  { %4442 = vsyncadd [#allocation4], 4294967040 }
0x1ff4   :  { %3702 = vsyncpa [#allocation3], 1 }
0x1ff5   :  { %3703 = vsyncpa [#allocation6], 1 }
0x1ff6   :  { %3704 = vsyncpa [#allocation4], 1 }

</bundles_post_ra>
